<compile_context>
chip_gen: v7x
topology: tpu7x:2x2x1
jax: 0.10.0
libtpu: 0.0.40
codegen_flags: <defaults>
</compile_context>

<pallas_src>
import functools

import jax
import jax.numpy as jnp
import numpy as np
from jax.experimental import pallas as pl
from jax.experimental.pallas import tpu as pltpu


def _sigmoid(z):
    return 1.0 / (1.0 + jnp.exp(-z))


# ----------------------------- fused Pallas kernel -------------------------- #

def fused_forward_kernel(*args, T, Bp, H, num_layers):
    """Fused multi-layer LSTM + Linear head.

    args layout (all VMEM refs):
      x_ref                       : (T*Bp, D_in)          time-major, flattened
      (w_ih, w_hh, b) * L         : (D_k, 4H), (H, 4H), (1, 4H)
      fc_w, fc_b                  : (H, num_keys), (1, num_keys)
      out_ref                     : (Bp, num_keys)
      seq_scr                     : (T*Bp, H) scratch     inter-layer activations
    """
    x_ref = args[0]
    layer_refs = args[1:1 + 3 * num_layers]
    fc_w_ref = args[1 + 3 * num_layers]
    fc_b_ref = args[2 + 3 * num_layers]
    out_ref = args[3 + 3 * num_layers]
    seq_scr = args[4 + 3 * num_layers]

    def run_layer(inp, w_ih_ref, w_hh_ref, b_ref, write_seq):
        # Hoisted input projection + bias: one big MXU matmul for all timesteps.
        gx = (jnp.dot(inp, w_ih_ref[...], preferred_element_type=jnp.float32)
              + b_ref[...])                                   # (T*Bp, 4H)
        w_hh = w_hh_ref[...]                                  # hoisted load
        h = jnp.zeros((Bp, H), jnp.float32)
        c = jnp.zeros((Bp, H), jnp.float32)
        for t in range(T):                                    # fully unrolled
            r = t * Bp
            gates = gx[r:r + Bp, :] + jnp.dot(
                h, w_hh, preferred_element_type=jnp.float32)  # (Bp, 4H)
            # Full-lane-width nonlinearities (2 EUP pushes), then per-gate slices.
            sig = _sigmoid(gates)
            tnh = jnp.tanh(gates)
            i_g = sig[:, 0 * H:1 * H]
            f_g = sig[:, 1 * H:2 * H]
            g_g = tnh[:, 2 * H:3 * H]
            o_g = sig[:, 3 * H:4 * H]
            c = f_g * c + i_g * g_g
            h = o_g * jnp.tanh(c)
            if write_seq:
                seq_scr[r:r + Bp, :] = h
        return h

    inp = x_ref[...]
    h_last = None
    for layer in range(num_layers):
        w_ih_ref, w_hh_ref, b_ref = layer_refs[3 * layer:3 * layer + 3]
        is_last = layer == num_layers - 1
        h_last = run_layer(inp, w_ih_ref, w_hh_ref, b_ref, write_seq=not is_last)
        if not is_last:
            inp = seq_scr[...]

    # FC head on the final hidden state only (out[:, -1, :] @ W_fc^T + b_fc).
    out_ref[...] = (jnp.dot(h_last, fc_w_ref[...],
                            preferred_element_type=jnp.float32)
                    + fc_b_ref[...])


# ---------------------------------- wrapper --------------------------------- #

def model_forward(params, x, hidden_size, num_layers):
    """Equivalent of Model.forward: x is (B, T, input_size), batch_first."""
    B, T, D_in = x.shape
    Bp = max(8, ((B + 7) // 8) * 8)          # pad batch to the f32 sublane tile

    # Plain-JAX glue (runs once, outside the kernel): time-major, pad, flatten.
    x_t = jnp.transpose(x, (1, 0, 2))                       # (T, B, D_in)
    if Bp != B:
        x_t = jnp.pad(x_t, ((0, 0), (0, Bp - B), (0, 0)))
    x_flat = x_t.reshape(T * Bp, D_in)                      # (T*Bp, D_in)

    flat_in = [x_flat]
    for layer in range(num_layers):
        w_ih_t, w_hh_t, b = params["lstm"][layer]
        flat_in += [w_ih_t, w_hh_t, b]
    fc_w_t, fc_b = params["fc"]
    flat_in += [fc_w_t, fc_b]
    num_keys = fc_w_t.shape[1]

    kernel = functools.partial(fused_forward_kernel, T=T, Bp=Bp,
                               H=hidden_size, num_layers=num_layers)
    out = pl.pallas_call(
        kernel,
        out_shape=jax.ShapeDtypeStruct((Bp, num_keys), jnp.float32),
        in_specs=[pl.BlockSpec(memory_space=pltpu.MemorySpace.VMEM)] * len(flat_in),
        out_specs=pl.BlockSpec(memory_space=pltpu.MemorySpace.VMEM),
        scratch_shapes=[pltpu.VMEM((T * Bp, hidden_size), jnp.float32)],
    )(*flat_in)
    return out[:B]


# --------------------------------- params ----------------------------------- #

def init_params(key, input_size, hidden_size, num_layers, num_keys):
    """Deterministic init matching torch shapes (uniform(-1/sqrt(H), 1/sqrt(H)))."""
    params = {"lstm": [], "fc": None}
    k = 1.0 / np.sqrt(hidden_size)
    for layer in range(num_layers):
        d_in = input_size if layer == 0 else hidden_size
        key, k1, k2, k3, k4 = jax.random.split(key, 5)
        w_ih = jax.random.uniform(k1, (4 * hidden_size, d_in), jnp.float32, -k, k)
        w_hh = jax.random.uniform(k2, (4 * hidden_size, hidden_size), jnp.float32, -k, k)
        b_ih = jax.random.uniform(k3, (4 * hidden_size,), jnp.float32, -k, k)
        b_hh = jax.random.uniform(k4, (4 * hidden_size,), jnp.float32, -k, k)
        # Pre-transpose weights and fuse biases for the kernel.
        params["lstm"].append((w_ih.T, w_hh.T, (b_ih + b_hh)[None, :]))
    key, k1, k2 = jax.random.split(key, 3)
    w_fc = jax.random.uniform(k1, (num_keys, hidden_size), jnp.float32, -k, k)
    b_fc = jax.random.uniform(k2, (num_keys,), jnp.float32, -k, k)
    params["fc"] = (w_fc.T, b_fc[None, :])
    return params


# ----------------------- pure-JAX reference (checking) ---------------------- #

def reference_forward(params, x, hidden_size, num_layers):
    B = x.shape[0]
    seq = jnp.transpose(x, (1, 0, 2))
    for layer in range(num_layers):
        w_ih_t, w_hh_t, b = params["lstm"][layer]
        h = jnp.zeros((B, hidden_size), jnp.float32)
        c = jnp.zeros((B, hidden_size), jnp.float32)
        outs = []
        H = hidden_size
        for t in range(seq.shape[0]):
            gates = seq[t] @ w_ih_t + h @ w_hh_t + b
            i_g = _sigmoid(gates[:, 0 * H:1 * H])
            f_g = _sigmoid(gates[:, 1 * H:2 * H])
            g_g = jnp.tanh(gates[:, 2 * H:3 * H])
            o_g = _sigmoid(gates[:, 3 * H:4 * H])
            c = f_g * c + i_g * g_g
            h = o_g * jnp.tanh(c)
            outs.append(h)
        seq = jnp.stack(outs, axis=0)
    w_fc_t, b_fc = params["fc"]
    return seq[-1] @ w_fc_t + b_fc


# ---------------------------------- main ------------------------------------ #

if __name__ == "__main__":
    batch, seq_len = 2, 8
    input_size, hidden_size, num_layers, num_keys = 8, 32, 2, 16

    key = jax.random.PRNGKey(0)
    key, pkey, xkey = jax.random.split(key, 3)
    params = init_params(pkey, input_size, hidden_size, num_layers, num_keys)
    x = jax.random.normal(xkey, (batch, seq_len, input_size), jnp.float32)

    out = model_forward(params, x, hidden_size, num_layers)
    out = jax.block_until_ready(out)

    ref = reference_forward(params, x, hidden_size, num_layers)
    np.testing.assert_allclose(np.asarray(out), np.asarray(ref),
                               rtol=1e-5, atol=1e-5)

    assert out.shape == (batch, num_keys)
    print("KERNEL_OK")
</pallas_src>

<mosaic_0001>
module attributes {stable_mosaic.version = 11 : i64} {
  func.func @fused_forward_kernel(%arg0: memref<64x8xf32, #tpu.memory_space<vmem>>, %arg1: memref<8x128xf32, #tpu.memory_space<vmem>>, %arg2: memref<32x128xf32, #tpu.memory_space<vmem>>, %arg3: memref<1x128xf32, #tpu.memory_space<vmem>>, %arg4: memref<32x128xf32, #tpu.memory_space<vmem>>, %arg5: memref<32x128xf32, #tpu.memory_space<vmem>>, %arg6: memref<1x128xf32, #tpu.memory_space<vmem>>, %arg7: memref<32x16xf32, #tpu.memory_space<vmem>>, %arg8: memref<1x16xf32, #tpu.memory_space<vmem>>, %arg9: memref<8x16xf32, #tpu.memory_space<vmem>>, %arg10: memref<64x32xf32, #tpu.memory_space<vmem>>) attributes {dimension_semantics = [], scalar_prefetch = 0 : i64, scratch_operands = 1 : i64, tpu.core_type = #tpu.core_type<tc>} {
    %c0 = arith.constant 0 : index
    %c0_0 = arith.constant 0 : index
    %0 = vector.load %arg0[%c0, %c0_0] : memref<64x8xf32, #tpu.memory_space<vmem>>, vector<64x8xf32>
    %c0_1 = arith.constant 0 : index
    %c0_2 = arith.constant 0 : index
    %1 = vector.load %arg1[%c0_1, %c0_2] : memref<8x128xf32, #tpu.memory_space<vmem>>, vector<8x128xf32>
    %cst = arith.constant dense<0.000000e+00> : vector<64x128xf32>
    %2 = tpu.matmul %0, %1, %cst {dimension_numbers = #tpu.dot_dimension_numbers<[1], [0], [0], [1], [0, 0, 1, 1], [], []>} : vector<64x8xf32>, vector<8x128xf32>, vector<64x128xf32> -> vector<64x128xf32>
    %c0_3 = arith.constant 0 : index
    %c0_4 = arith.constant 0 : index
    %3 = vector.load %arg3[%c0_3, %c0_4] : memref<1x128xf32, #tpu.memory_space<vmem>>, vector<1x128xf32>
    %4 = vector.broadcast %3 : vector<1x128xf32> to vector<64x128xf32>
    %5 = arith.addf %2, %4 : vector<64x128xf32>
    %c0_5 = arith.constant 0 : index
    %c0_6 = arith.constant 0 : index
    %6 = vector.load %arg2[%c0_5, %c0_6] : memref<32x128xf32, #tpu.memory_space<vmem>>, vector<32x128xf32>
    %cst_7 = arith.constant 0.000000e+00 : f32
    %7 = vector.broadcast %cst_7 : f32 to vector<8x32xf32>
    %cst_8 = arith.constant 0.000000e+00 : f32
    %8 = vector.broadcast %cst_8 : f32 to vector<8x32xf32>
    %9 = vector.extract_strided_slice %5 {offsets = [0, 0], sizes = [8, 128], strides = [1, 1]} : vector<64x128xf32> to vector<8x128xf32>
    %cst_9 = arith.constant dense<0.000000e+00> : vector<8x128xf32>
    %10 = tpu.matmul %7, %6, %cst_9 {dimension_numbers = #tpu.dot_dimension_numbers<[1], [0], [0], [1], [0, 0, 1, 1], [], []>} : vector<8x32xf32>, vector<32x128xf32>, vector<8x128xf32> -> vector<8x128xf32>
    %11 = arith.addf %9, %10 : vector<8x128xf32>
    %cst_10 = arith.constant 0.000000e+00 : f32
    %12 = vector.broadcast %cst_10 : f32 to vector<8x128xf32>
    %13 = arith.subf %12, %11 : vector<8x128xf32>
    %14 = math.exp %13 : vector<8x128xf32>
    %cst_11 = arith.constant 1.000000e+00 : f32
    %15 = vector.broadcast %cst_11 : f32 to vector<8x128xf32>
    %16 = arith.addf %15, %14 : vector<8x128xf32>
    %cst_12 = arith.constant 1.000000e+00 : f32
    %17 = vector.broadcast %cst_12 : f32 to vector<8x128xf32>
    %18 = arith.divf %17, %16 : vector<8x128xf32>
    %19 = math.tanh %11 : vector<8x128xf32>
    %20 = vector.extract_strided_slice %18 {offsets = [0, 0], sizes = [8, 32], strides = [1, 1]} : vector<8x128xf32> to vector<8x32xf32>
    %21 = vector.extract_strided_slice %18 {offsets = [0, 32], sizes = [8, 32], strides = [1, 1]} : vector<8x128xf32> to vector<8x32xf32>
    %22 = vector.extract_strided_slice %19 {offsets = [0, 64], sizes = [8, 32], strides = [1, 1]} : vector<8x128xf32> to vector<8x32xf32>
    %23 = vector.extract_strided_slice %18 {offsets = [0, 96], sizes = [8, 32], strides = [1, 1]} : vector<8x128xf32> to vector<8x32xf32>
    %24 = arith.mulf %21, %8 : vector<8x32xf32>
    %25 = arith.mulf %20, %22 : vector<8x32xf32>
    %26 = arith.addf %24, %25 : vector<8x32xf32>
    %27 = math.tanh %26 : vector<8x32xf32>
    %28 = arith.mulf %23, %27 : vector<8x32xf32>
    %c0_13 = arith.constant 0 : index
    %c0_14 = arith.constant 0 : index
    %29 = vector.load %arg10[%c0_13, %c0_14] : memref<64x32xf32, #tpu.memory_space<vmem>>, vector<8x32xf32>
    tpu.vector_store %arg10[%c0_13, %c0_14], %28 {strides = array<i32>} : memref<64x32xf32, #tpu.memory_space<vmem>>, vector<8x32xf32>,
    %30 = vector.extract_strided_slice %5 {offsets = [8, 0], sizes = [8, 128], strides = [1, 1]} : vector<64x128xf32> to vector<8x128xf32>
    %cst_15 = arith.constant dense<0.000000e+00> : vector<8x128xf32>
    %31 = tpu.matmul %28, %6, %cst_15 {dimension_numbers = #tpu.dot_dimension_numbers<[1], [0], [0], [1], [0, 0, 1, 1], [], []>} : vector<8x32xf32>, vector<32x128xf32>, vector<8x128xf32> -> vector<8x128xf32>
    %32 = arith.addf %30, %31 : vector<8x128xf32>
    %cst_16 = arith.constant 0.000000e+00 : f32
    %33 = vector.broadcast %cst_16 : f32 to vector<8x128xf32>
    %34 = arith.subf %33, %32 : vector<8x128xf32>
    %35 = math.exp %34 : vector<8x128xf32>
    %cst_17 = arith.constant 1.000000e+00 : f32
    %36 = vector.broadcast %cst_17 : f32 to vector<8x128xf32>
    %37 = arith.addf %36, %35 : vector<8x128xf32>
    %cst_18 = arith.constant 1.000000e+00 : f32
    %38 = vector.broadcast %cst_18 : f32 to vector<8x128xf32>
    %39 = arith.divf %38, %37 : vector<8x128xf32>
    %40 = math.tanh %32 : vector<8x128xf32>
    %41 = vector.extract_strided_slice %39 {offsets = [0, 0], sizes = [8, 32], strides = [1, 1]} : vector<8x128xf32> to vector<8x32xf32>
    %42 = vector.extract_strided_slice %39 {offsets = [0, 32], sizes = [8, 32], strides = [1, 1]} : vector<8x128xf32> to vector<8x32xf32>
    %43 = vector.extract_strided_slice %40 {offsets = [0, 64], sizes = [8, 32], strides = [1, 1]} : vector<8x128xf32> to vector<8x32xf32>
    %44 = vector.extract_strided_slice %39 {offsets = [0, 96], sizes = [8, 32], strides = [1, 1]} : vector<8x128xf32> to vector<8x32xf32>
    %45 = arith.mulf %42, %26 : vector<8x32xf32>
    %46 = arith.mulf %41, %43 : vector<8x32xf32>
    %47 = arith.addf %45, %46 : vector<8x32xf32>
    %48 = math.tanh %47 : vector<8x32xf32>
    %49 = arith.mulf %44, %48 : vector<8x32xf32>
    %c8 = arith.constant 8 : index
    %c0_19 = arith.constant 0 : index
    %50 = vector.load %arg10[%c8, %c0_19] : memref<64x32xf32, #tpu.memory_space<vmem>>, vector<8x32xf32>
    tpu.vector_store %arg10[%c8, %c0_19], %49 {strides = array<i32>} : memref<64x32xf32, #tpu.memory_space<vmem>>, vector<8x32xf32>,
    %51 = vector.extract_strided_slice %5 {offsets = [16, 0], sizes = [8, 128], strides = [1, 1]} : vector<64x128xf32> to vector<8x128xf32>
    %cst_20 = arith.constant dense<0.000000e+00> : vector<8x128xf32>
    %52 = tpu.matmul %49, %6, %cst_20 {dimension_numbers = #tpu.dot_dimension_numbers<[1], [0], [0], [1], [0, 0, 1, 1], [], []>} : vector<8x32xf32>, vector<32x128xf32>, vector<8x128xf32> -> vector<8x128xf32>
    %53 = arith.addf %51, %52 : vector<8x128xf32>
    %cst_21 = arith.constant 0.000000e+00 : f32
    %54 = vector.broadcast %cst_21 : f32 to vector<8x128xf32>
    %55 = arith.subf %54, %53 : vector<8x128xf32>
    %56 = math.exp %55 : vector<8x128xf32>
    %cst_22 = arith.constant 1.000000e+00 : f32
    %57 = vector.broadcast %cst_22 : f32 to vector<8x128xf32>
    %58 = arith.addf %57, %56 : vector<8x128xf32>
    %cst_23 = arith.constant 1.000000e+00 : f32
    %59 = vector.broadcast %cst_23 : f32 to vector<8x128xf32>
    %60 = arith.divf %59, %58 : vector<8x128xf32>
    %61 = math.tanh %53 : vector<8x128xf32>
    %62 = vector.extract_strided_slice %60 {offsets = [0, 0], sizes = [8, 32], strides = [1, 1]} : vector<8x128xf32> to vector<8x32xf32>
    %63 = vector.extract_strided_slice %60 {offsets = [0, 32], sizes = [8, 32], strides = [1, 1]} : vector<8x128xf32> to vector<8x32xf32>
    %64 = vector.extract_strided_slice %61 {offsets = [0, 64], sizes = [8, 32], strides = [1, 1]} : vector<8x128xf32> to vector<8x32xf32>
    %65 = vector.extract_strided_slice %60 {offsets = [0, 96], sizes = [8, 32], strides = [1, 1]} : vector<8x128xf32> to vector<8x32xf32>
    %66 = arith.mulf %63, %47 : vector<8x32xf32>
    %67 = arith.mulf %62, %64 : vector<8x32xf32>
    %68 = arith.addf %66, %67 : vector<8x32xf32>
    %69 = math.tanh %68 : vector<8x32xf32>
    %70 = arith.mulf %65, %69 : vector<8x32xf32>
    %c16 = arith.constant 16 : index
    %c0_24 = arith.constant 0 : index
    %71 = vector.load %arg10[%c16, %c0_24] : memref<64x32xf32, #tpu.memory_space<vmem>>, vector<8x32xf32>
    tpu.vector_store %arg10[%c16, %c0_24], %70 {strides = array<i32>} : memref<64x32xf32, #tpu.memory_space<vmem>>, vector<8x32xf32>,
    %72 = vector.extract_strided_slice %5 {offsets = [24, 0], sizes = [8, 128], strides = [1, 1]} : vector<64x128xf32> to vector<8x128xf32>
    %cst_25 = arith.constant dense<0.000000e+00> : vector<8x128xf32>
    %73 = tpu.matmul %70, %6, %cst_25 {dimension_numbers = #tpu.dot_dimension_numbers<[1], [0], [0], [1], [0, 0, 1, 1], [], []>} : vector<8x32xf32>, vector<32x128xf32>, vector<8x128xf32> -> vector<8x128xf32>
    %74 = arith.addf %72, %73 : vector<8x128xf32>
    %cst_26 = arith.constant 0.000000e+00 : f32
    %75 = vector.broadcast %cst_26 : f32 to vector<8x128xf32>
    %76 = arith.subf %75, %74 : vector<8x128xf32>
    %77 = math.exp %76 : vector<8x128xf32>
    %cst_27 = arith.constant 1.000000e+00 : f32
    %78 = vector.broadcast %cst_27 : f32 to vector<8x128xf32>
    %79 = arith.addf %78, %77 : vector<8x128xf32>
    %cst_28 = arith.constant 1.000000e+00 : f32
    %80 = vector.broadcast %cst_28 : f32 to vector<8x128xf32>
    %81 = arith.divf %80, %79 : vector<8x128xf32>
    %82 = math.tanh %74 : vector<8x128xf32>
    %83 = vector.extract_strided_slice %81 {offsets = [0, 0], sizes = [8, 32], strides = [1, 1]} : vector<8x128xf32> to vector<8x32xf32>
    %84 = vector.extract_strided_slice %81 {offsets = [0, 32], sizes = [8, 32], strides = [1, 1]} : vector<8x128xf32> to vector<8x32xf32>
    %85 = vector.extract_strided_slice %82 {offsets = [0, 64], sizes = [8, 32], strides = [1, 1]} : vector<8x128xf32> to vector<8x32xf32>
    %86 = vector.extract_strided_slice %81 {offsets = [0, 96], sizes = [8, 32], strides = [1, 1]} : vector<8x128xf32> to vector<8x32xf32>
    %87 = arith.mulf %84, %68 : vector<8x32xf32>
    %88 = arith.mulf %83, %85 : vector<8x32xf32>
    %89 = arith.addf %87, %88 : vector<8x32xf32>
    %90 = math.tanh %89 : vector<8x32xf32>
    %91 = arith.mulf %86, %90 : vector<8x32xf32>
    %c24 = arith.constant 24 : index
    %c0_29 = arith.constant 0 : index
    %92 = vector.load %arg10[%c24, %c0_29] : memref<64x32xf32, #tpu.memory_space<vmem>>, vector<8x32xf32>
    tpu.vector_store %arg10[%c24, %c0_29], %91 {strides = array<i32>} : memref<64x32xf32, #tpu.memory_space<vmem>>, vector<8x32xf32>,
    %93 = vector.extract_strided_slice %5 {offsets = [32, 0], sizes = [8, 128], strides = [1, 1]} : vector<64x128xf32> to vector<8x128xf32>
    %cst_30 = arith.constant dense<0.000000e+00> : vector<8x128xf32>
    %94 = tpu.matmul %91, %6, %cst_30 {dimension_numbers = #tpu.dot_dimension_numbers<[1], [0], [0], [1], [0, 0, 1, 1], [], []>} : vector<8x32xf32>, vector<32x128xf32>, vector<8x128xf32> -> vector<8x128xf32>
    %95 = arith.addf %93, %94 : vector<8x128xf32>
    %cst_31 = arith.constant 0.000000e+00 : f32
    %96 = vector.broadcast %cst_31 : f32 to vector<8x128xf32>
    %97 = arith.subf %96, %95 : vector<8x128xf32>
    %98 = math.exp %97 : vector<8x128xf32>
    %cst_32 = arith.constant 1.000000e+00 : f32
    %99 = vector.broadcast %cst_32 : f32 to vector<8x128xf32>
    %100 = arith.addf %99, %98 : vector<8x128xf32>
    %cst_33 = arith.constant 1.000000e+00 : f32
    %101 = vector.broadcast %cst_33 : f32 to vector<8x128xf32>
    %102 = arith.divf %101, %100 : vector<8x128xf32>
    %103 = math.tanh %95 : vector<8x128xf32>
    %104 = vector.extract_strided_slice %102 {offsets = [0, 0], sizes = [8, 32], strides = [1, 1]} : vector<8x128xf32> to vector<8x32xf32>
    %105 = vector.extract_strided_slice %102 {offsets = [0, 32], sizes = [8, 32], strides = [1, 1]} : vector<8x128xf32> to vector<8x32xf32>
    %106 = vector.extract_strided_slice %103 {offsets = [0, 64], sizes = [8, 32], strides = [1, 1]} : vector<8x128xf32> to vector<8x32xf32>
    %107 = vector.extract_strided_slice %102 {offsets = [0, 96], sizes = [8, 32], strides = [1, 1]} : vector<8x128xf32> to vector<8x32xf32>
    %108 = arith.mulf %105, %89 : vector<8x32xf32>
    %109 = arith.mulf %104, %106 : vector<8x32xf32>
    %110 = arith.addf %108, %109 : vector<8x32xf32>
    %111 = math.tanh %110 : vector<8x32xf32>
    %112 = arith.mulf %107, %111 : vector<8x32xf32>
    %c32 = arith.constant 32 : index
    %c0_34 = arith.constant 0 : index
    %113 = vector.load %arg10[%c32, %c0_34] : memref<64x32xf32, #tpu.memory_space<vmem>>, vector<8x32xf32>
    tpu.vector_store %arg10[%c32, %c0_34], %112 {strides = array<i32>} : memref<64x32xf32, #tpu.memory_space<vmem>>, vector<8x32xf32>,
    %114 = vector.extract_strided_slice %5 {offsets = [40, 0], sizes = [8, 128], strides = [1, 1]} : vector<64x128xf32> to vector<8x128xf32>
    %cst_35 = arith.constant dense<0.000000e+00> : vector<8x128xf32>
    %115 = tpu.matmul %112, %6, %cst_35 {dimension_numbers = #tpu.dot_dimension_numbers<[1], [0], [0], [1], [0, 0, 1, 1], [], []>} : vector<8x32xf32>, vector<32x128xf32>, vector<8x128xf32> -> vector<8x128xf32>
    %116 = arith.addf %114, %115 : vector<8x128xf32>
    %cst_36 = arith.constant 0.000000e+00 : f32
    %117 = vector.broadcast %cst_36 : f32 to vector<8x128xf32>
    %118 = arith.subf %117, %116 : vector<8x128xf32>
    %119 = math.exp %118 : vector<8x128xf32>
    %cst_37 = arith.constant 1.000000e+00 : f32
    %120 = vector.broadcast %cst_37 : f32 to vector<8x128xf32>
    %121 = arith.addf %120, %119 : vector<8x128xf32>
    %cst_38 = arith.constant 1.000000e+00 : f32
    %122 = vector.broadcast %cst_38 : f32 to vector<8x128xf32>
    %123 = arith.divf %122, %121 : vector<8x128xf32>
    %124 = math.tanh %116 : vector<8x128xf32>
    %125 = vector.extract_strided_slice %123 {offsets = [0, 0], sizes = [8, 32], strides = [1, 1]} : vector<8x128xf32> to vector<8x32xf32>
    %126 = vector.extract_strided_slice %123 {offsets = [0, 32], sizes = [8, 32], strides = [1, 1]} : vector<8x128xf32> to vector<8x32xf32>
    %127 = vector.extract_strided_slice %124 {offsets = [0, 64], sizes = [8, 32], strides = [1, 1]} : vector<8x128xf32> to vector<8x32xf32>
    %128 = vector.extract_strided_slice %123 {offsets = [0, 96], sizes = [8, 32], strides = [1, 1]} : vector<8x128xf32> to vector<8x32xf32>
    %129 = arith.mulf %126, %110 : vector<8x32xf32>
    %130 = arith.mulf %125, %127 : vector<8x32xf32>
    %131 = arith.addf %129, %130 : vector<8x32xf32>
    %132 = math.tanh %131 : vector<8x32xf32>
    %133 = arith.mulf %128, %132 : vector<8x32xf32>
    %c40 = arith.constant 40 : index
    %c0_39 = arith.constant 0 : index
    %134 = vector.load %arg10[%c40, %c0_39] : memref<64x32xf32, #tpu.memory_space<vmem>>, vector<8x32xf32>
    tpu.vector_store %arg10[%c40, %c0_39], %133 {strides = array<i32>} : memref<64x32xf32, #tpu.memory_space<vmem>>, vector<8x32xf32>,
    %135 = vector.extract_strided_slice %5 {offsets = [48, 0], sizes = [8, 128], strides = [1, 1]} : vector<64x128xf32> to vector<8x128xf32>
    %cst_40 = arith.constant dense<0.000000e+00> : vector<8x128xf32>
    %136 = tpu.matmul %133, %6, %cst_40 {dimension_numbers = #tpu.dot_dimension_numbers<[1], [0], [0], [1], [0, 0, 1, 1], [], []>} : vector<8x32xf32>, vector<32x128xf32>, vector<8x128xf32> -> vector<8x128xf32>
    %137 = arith.addf %135, %136 : vector<8x128xf32>
    %cst_41 = arith.constant 0.000000e+00 : f32
    %138 = vector.broadcast %cst_41 : f32 to vector<8x128xf32>
    %139 = arith.subf %138, %137 : vector<8x128xf32>
    %140 = math.exp %139 : vector<8x128xf32>
    %cst_42 = arith.constant 1.000000e+00 : f32
    %141 = vector.broadcast %cst_42 : f32 to vector<8x128xf32>
    %142 = arith.addf %141, %140 : vector<8x128xf32>
    %cst_43 = arith.constant 1.000000e+00 : f32
    %143 = vector.broadcast %cst_43 : f32 to vector<8x128xf32>
    %144 = arith.divf %143, %142 : vector<8x128xf32>
    %145 = math.tanh %137 : vector<8x128xf32>
    %146 = vector.extract_strided_slice %144 {offsets = [0, 0], sizes = [8, 32], strides = [1, 1]} : vector<8x128xf32> to vector<8x32xf32>
    %147 = vector.extract_strided_slice %144 {offsets = [0, 32], sizes = [8, 32], strides = [1, 1]} : vector<8x128xf32> to vector<8x32xf32>
    %148 = vector.extract_strided_slice %145 {offsets = [0, 64], sizes = [8, 32], strides = [1, 1]} : vector<8x128xf32> to vector<8x32xf32>
    %149 = vector.extract_strided_slice %144 {offsets = [0, 96], sizes = [8, 32], strides = [1, 1]} : vector<8x128xf32> to vector<8x32xf32>
    %150 = arith.mulf %147, %131 : vector<8x32xf32>
    %151 = arith.mulf %146, %148 : vector<8x32xf32>
    %152 = arith.addf %150, %151 : vector<8x32xf32>
    %153 = math.tanh %152 : vector<8x32xf32>
    %154 = arith.mulf %149, %153 : vector<8x32xf32>
    %c48 = arith.constant 48 : index
    %c0_44 = arith.constant 0 : index
    %155 = vector.load %arg10[%c48, %c0_44] : memref<64x32xf32, #tpu.memory_space<vmem>>, vector<8x32xf32>
    tpu.vector_store %arg10[%c48, %c0_44], %154 {strides = array<i32>} : memref<64x32xf32, #tpu.memory_space<vmem>>, vector<8x32xf32>,
    %156 = vector.extract_strided_slice %5 {offsets = [56, 0], sizes = [8, 128], strides = [1, 1]} : vector<64x128xf32> to vector<8x128xf32>
    %cst_45 = arith.constant dense<0.000000e+00> : vector<8x128xf32>
    %157 = tpu.matmul %154, %6, %cst_45 {dimension_numbers = #tpu.dot_dimension_numbers<[1], [0], [0], [1], [0, 0, 1, 1], [], []>} : vector<8x32xf32>, vector<32x128xf32>, vector<8x128xf32> -> vector<8x128xf32>
    %158 = arith.addf %156, %157 : vector<8x128xf32>
    %cst_46 = arith.constant 0.000000e+00 : f32
    %159 = vector.broadcast %cst_46 : f32 to vector<8x128xf32>
    %160 = arith.subf %159, %158 : vector<8x128xf32>
    %161 = math.exp %160 : vector<8x128xf32>
    %cst_47 = arith.constant 1.000000e+00 : f32
    %162 = vector.broadcast %cst_47 : f32 to vector<8x128xf32>
    %163 = arith.addf %162, %161 : vector<8x128xf32>
    %cst_48 = arith.constant 1.000000e+00 : f32
    %164 = vector.broadcast %cst_48 : f32 to vector<8x128xf32>
    %165 = arith.divf %164, %163 : vector<8x128xf32>
    %166 = math.tanh %158 : vector<8x128xf32>
    %167 = vector.extract_strided_slice %165 {offsets = [0, 0], sizes = [8, 32], strides = [1, 1]} : vector<8x128xf32> to vector<8x32xf32>
    %168 = vector.extract_strided_slice %165 {offsets = [0, 32], sizes = [8, 32], strides = [1, 1]} : vector<8x128xf32> to vector<8x32xf32>
    %169 = vector.extract_strided_slice %166 {offsets = [0, 64], sizes = [8, 32], strides = [1, 1]} : vector<8x128xf32> to vector<8x32xf32>
    %170 = vector.extract_strided_slice %165 {offsets = [0, 96], sizes = [8, 32], strides = [1, 1]} : vector<8x128xf32> to vector<8x32xf32>
    %171 = arith.mulf %168, %152 : vector<8x32xf32>
    %172 = arith.mulf %167, %169 : vector<8x32xf32>
    %173 = arith.addf %171, %172 : vector<8x32xf32>
    %174 = math.tanh %173 : vector<8x32xf32>
    %175 = arith.mulf %170, %174 : vector<8x32xf32>
    %c56 = arith.constant 56 : index
    %c0_49 = arith.constant 0 : index
    %176 = vector.load %arg10[%c56, %c0_49] : memref<64x32xf32, #tpu.memory_space<vmem>>, vector<8x32xf32>
    tpu.vector_store %arg10[%c56, %c0_49], %175 {strides = array<i32>} : memref<64x32xf32, #tpu.memory_space<vmem>>, vector<8x32xf32>,
    %c0_50 = arith.constant 0 : index
    %c0_51 = arith.constant 0 : index
    %177 = vector.load %arg10[%c0_50, %c0_51] : memref<64x32xf32, #tpu.memory_space<vmem>>, vector<64x32xf32>
    %c0_52 = arith.constant 0 : index
    %c0_53 = arith.constant 0 : index
    %178 = vector.load %arg4[%c0_52, %c0_53] : memref<32x128xf32, #tpu.memory_space<vmem>>, vector<32x128xf32>
    %cst_54 = arith.constant dense<0.000000e+00> : vector<64x128xf32>
    %179 = tpu.matmul %177, %178, %cst_54 {dimension_numbers = #tpu.dot_dimension_numbers<[1], [0], [0], [1], [0, 0, 1, 1], [], []>} : vector<64x32xf32>, vector<32x128xf32>, vector<64x128xf32> -> vector<64x128xf32>
    %c0_55 = arith.constant 0 : index
    %c0_56 = arith.constant 0 : index
    %180 = vector.load %arg6[%c0_55, %c0_56] : memref<1x128xf32, #tpu.memory_space<vmem>>, vector<1x128xf32>
    %181 = vector.broadcast %180 : vector<1x128xf32> to vector<64x128xf32>
    %182 = arith.addf %179, %181 : vector<64x128xf32>
    %c0_57 = arith.constant 0 : index
    %c0_58 = arith.constant 0 : index
    %183 = vector.load %arg5[%c0_57, %c0_58] : memref<32x128xf32, #tpu.memory_space<vmem>>, vector<32x128xf32>
    %cst_59 = arith.constant 0.000000e+00 : f32
    %184 = vector.broadcast %cst_59 : f32 to vector<8x32xf32>
    %cst_60 = arith.constant 0.000000e+00 : f32
    %185 = vector.broadcast %cst_60 : f32 to vector<8x32xf32>
    %186 = vector.extract_strided_slice %182 {offsets = [0, 0], sizes = [8, 128], strides = [1, 1]} : vector<64x128xf32> to vector<8x128xf32>
    %cst_61 = arith.constant dense<0.000000e+00> : vector<8x128xf32>
    %187 = tpu.matmul %184, %183, %cst_61 {dimension_numbers = #tpu.dot_dimension_numbers<[1], [0], [0], [1], [0, 0, 1, 1], [], []>} : vector<8x32xf32>, vector<32x128xf32>, vector<8x128xf32> -> vector<8x128xf32>
    %188 = arith.addf %186, %187 : vector<8x128xf32>
    %cst_62 = arith.constant 0.000000e+00 : f32
    %189 = vector.broadcast %cst_62 : f32 to vector<8x128xf32>
    %190 = arith.subf %189, %188 : vector<8x128xf32>
    %191 = math.exp %190 : vector<8x128xf32>
    %cst_63 = arith.constant 1.000000e+00 : f32
    %192 = vector.broadcast %cst_63 : f32 to vector<8x128xf32>
    %193 = arith.addf %192, %191 : vector<8x128xf32>
    %cst_64 = arith.constant 1.000000e+00 : f32
    %194 = vector.broadcast %cst_64 : f32 to vector<8x128xf32>
    %195 = arith.divf %194, %193 : vector<8x128xf32>
    %196 = math.tanh %188 : vector<8x128xf32>
    %197 = vector.extract_strided_slice %195 {offsets = [0, 0], sizes = [8, 32], strides = [1, 1]} : vector<8x128xf32> to vector<8x32xf32>
    %198 = vector.extract_strided_slice %195 {offsets = [0, 32], sizes = [8, 32], strides = [1, 1]} : vector<8x128xf32> to vector<8x32xf32>
    %199 = vector.extract_strided_slice %196 {offsets = [0, 64], sizes = [8, 32], strides = [1, 1]} : vector<8x128xf32> to vector<8x32xf32>
    %200 = vector.extract_strided_slice %195 {offsets = [0, 96], sizes = [8, 32], strides = [1, 1]} : vector<8x128xf32> to vector<8x32xf32>
    %201 = arith.mulf %198, %185 : vector<8x32xf32>
    %202 = arith.mulf %197, %199 : vector<8x32xf32>
    %203 = arith.addf %201, %202 : vector<8x32xf32>
    %204 = math.tanh %203 : vector<8x32xf32>
    %205 = arith.mulf %200, %204 : vector<8x32xf32>
    %206 = vector.extract_strided_slice %182 {offsets = [8, 0], sizes = [8, 128], strides = [1, 1]} : vector<64x128xf32> to vector<8x128xf32>
    %cst_65 = arith.constant dense<0.000000e+00> : vector<8x128xf32>
    %207 = tpu.matmul %205, %183, %cst_65 {dimension_numbers = #tpu.dot_dimension_numbers<[1], [0], [0], [1], [0, 0, 1, 1], [], []>} : vector<8x32xf32>, vector<32x128xf32>, vector<8x128xf32> -> vector<8x128xf32>
    %208 = arith.addf %206, %207 : vector<8x128xf32>
    %cst_66 = arith.constant 0.000000e+00 : f32
    %209 = vector.broadcast %cst_66 : f32 to vector<8x128xf32>
    %210 = arith.subf %209, %208 : vector<8x128xf32>
    %211 = math.exp %210 : vector<8x128xf32>
    %cst_67 = arith.constant 1.000000e+00 : f32
    %212 = vector.broadcast %cst_67 : f32 to vector<8x128xf32>
    %213 = arith.addf %212, %211 : vector<8x128xf32>
    %cst_68 = arith.constant 1.000000e+00 : f32
    %214 = vector.broadcast %cst_68 : f32 to vector<8x128xf32>
    %215 = arith.divf %214, %213 : vector<8x128xf32>
    %216 = math.tanh %208 : vector<8x128xf32>
    %217 = vector.extract_strided_slice %215 {offsets = [0, 0], sizes = [8, 32], strides = [1, 1]} : vector<8x128xf32> to vector<8x32xf32>
    %218 = vector.extract_strided_slice %215 {offsets = [0, 32], sizes = [8, 32], strides = [1, 1]} : vector<8x128xf32> to vector<8x32xf32>
    %219 = vector.extract_strided_slice %216 {offsets = [0, 64], sizes = [8, 32], strides = [1, 1]} : vector<8x128xf32> to vector<8x32xf32>
    %220 = vector.extract_strided_slice %215 {offsets = [0, 96], sizes = [8, 32], strides = [1, 1]} : vector<8x128xf32> to vector<8x32xf32>
    %221 = arith.mulf %218, %203 : vector<8x32xf32>
    %222 = arith.mulf %217, %219 : vector<8x32xf32>
    %223 = arith.addf %221, %222 : vector<8x32xf32>
    %224 = math.tanh %223 : vector<8x32xf32>
    %225 = arith.mulf %220, %224 : vector<8x32xf32>
    %226 = vector.extract_strided_slice %182 {offsets = [16, 0], sizes = [8, 128], strides = [1, 1]} : vector<64x128xf32> to vector<8x128xf32>
    %cst_69 = arith.constant dense<0.000000e+00> : vector<8x128xf32>
    %227 = tpu.matmul %225, %183, %cst_69 {dimension_numbers = #tpu.dot_dimension_numbers<[1], [0], [0], [1], [0, 0, 1, 1], [], []>} : vector<8x32xf32>, vector<32x128xf32>, vector<8x128xf32> -> vector<8x128xf32>
    %228 = arith.addf %226, %227 : vector<8x128xf32>
    %cst_70 = arith.constant 0.000000e+00 : f32
    %229 = vector.broadcast %cst_70 : f32 to vector<8x128xf32>
    %230 = arith.subf %229, %228 : vector<8x128xf32>
    %231 = math.exp %230 : vector<8x128xf32>
    %cst_71 = arith.constant 1.000000e+00 : f32
    %232 = vector.broadcast %cst_71 : f32 to vector<8x128xf32>
    %233 = arith.addf %232, %231 : vector<8x128xf32>
    %cst_72 = arith.constant 1.000000e+00 : f32
    %234 = vector.broadcast %cst_72 : f32 to vector<8x128xf32>
    %235 = arith.divf %234, %233 : vector<8x128xf32>
    %236 = math.tanh %228 : vector<8x128xf32>
    %237 = vector.extract_strided_slice %235 {offsets = [0, 0], sizes = [8, 32], strides = [1, 1]} : vector<8x128xf32> to vector<8x32xf32>
    %238 = vector.extract_strided_slice %235 {offsets = [0, 32], sizes = [8, 32], strides = [1, 1]} : vector<8x128xf32> to vector<8x32xf32>
    %239 = vector.extract_strided_slice %236 {offsets = [0, 64], sizes = [8, 32], strides = [1, 1]} : vector<8x128xf32> to vector<8x32xf32>
    %240 = vector.extract_strided_slice %235 {offsets = [0, 96], sizes = [8, 32], strides = [1, 1]} : vector<8x128xf32> to vector<8x32xf32>
    %241 = arith.mulf %238, %223 : vector<8x32xf32>
    %242 = arith.mulf %237, %239 : vector<8x32xf32>
    %243 = arith.addf %241, %242 : vector<8x32xf32>
    %244 = math.tanh %243 : vector<8x32xf32>
    %245 = arith.mulf %240, %244 : vector<8x32xf32>
    %246 = vector.extract_strided_slice %182 {offsets = [24, 0], sizes = [8, 128], strides = [1, 1]} : vector<64x128xf32> to vector<8x128xf32>
    %cst_73 = arith.constant dense<0.000000e+00> : vector<8x128xf32>
    %247 = tpu.matmul %245, %183, %cst_73 {dimension_numbers = #tpu.dot_dimension_numbers<[1], [0], [0], [1], [0, 0, 1, 1], [], []>} : vector<8x32xf32>, vector<32x128xf32>, vector<8x128xf32> -> vector<8x128xf32>
    %248 = arith.addf %246, %247 : vector<8x128xf32>
    %cst_74 = arith.constant 0.000000e+00 : f32
    %249 = vector.broadcast %cst_74 : f32 to vector<8x128xf32>
    %250 = arith.subf %249, %248 : vector<8x128xf32>
    %251 = math.exp %250 : vector<8x128xf32>
    %cst_75 = arith.constant 1.000000e+00 : f32
    %252 = vector.broadcast %cst_75 : f32 to vector<8x128xf32>
    %253 = arith.addf %252, %251 : vector<8x128xf32>
    %cst_76 = arith.constant 1.000000e+00 : f32
    %254 = vector.broadcast %cst_76 : f32 to vector<8x128xf32>
    %255 = arith.divf %254, %253 : vector<8x128xf32>
    %256 = math.tanh %248 : vector<8x128xf32>
    %257 = vector.extract_strided_slice %255 {offsets = [0, 0], sizes = [8, 32], strides = [1, 1]} : vector<8x128xf32> to vector<8x32xf32>
    %258 = vector.extract_strided_slice %255 {offsets = [0, 32], sizes = [8, 32], strides = [1, 1]} : vector<8x128xf32> to vector<8x32xf32>
    %259 = vector.extract_strided_slice %256 {offsets = [0, 64], sizes = [8, 32], strides = [1, 1]} : vector<8x128xf32> to vector<8x32xf32>
    %260 = vector.extract_strided_slice %255 {offsets = [0, 96], sizes = [8, 32], strides = [1, 1]} : vector<8x128xf32> to vector<8x32xf32>
    %261 = arith.mulf %258, %243 : vector<8x32xf32>
    %262 = arith.mulf %257, %259 : vector<8x32xf32>
    %263 = arith.addf %261, %262 : vector<8x32xf32>
    %264 = math.tanh %263 : vector<8x32xf32>
    %265 = arith.mulf %260, %264 : vector<8x32xf32>
    %266 = vector.extract_strided_slice %182 {offsets = [32, 0], sizes = [8, 128], strides = [1, 1]} : vector<64x128xf32> to vector<8x128xf32>
    %cst_77 = arith.constant dense<0.000000e+00> : vector<8x128xf32>
    %267 = tpu.matmul %265, %183, %cst_77 {dimension_numbers = #tpu.dot_dimension_numbers<[1], [0], [0], [1], [0, 0, 1, 1], [], []>} : vector<8x32xf32>, vector<32x128xf32>, vector<8x128xf32> -> vector<8x128xf32>
    %268 = arith.addf %266, %267 : vector<8x128xf32>
    %cst_78 = arith.constant 0.000000e+00 : f32
    %269 = vector.broadcast %cst_78 : f32 to vector<8x128xf32>
    %270 = arith.subf %269, %268 : vector<8x128xf32>
    %271 = math.exp %270 : vector<8x128xf32>
    %cst_79 = arith.constant 1.000000e+00 : f32
    %272 = vector.broadcast %cst_79 : f32 to vector<8x128xf32>
    %273 = arith.addf %272, %271 : vector<8x128xf32>
    %cst_80 = arith.constant 1.000000e+00 : f32
    %274 = vector.broadcast %cst_80 : f32 to vector<8x128xf32>
    %275 = arith.divf %274, %273 : vector<8x128xf32>
    %276 = math.tanh %268 : vector<8x128xf32>
    %277 = vector.extract_strided_slice %275 {offsets = [0, 0], sizes = [8, 32], strides = [1, 1]} : vector<8x128xf32> to vector<8x32xf32>
    %278 = vector.extract_strided_slice %275 {offsets = [0, 32], sizes = [8, 32], strides = [1, 1]} : vector<8x128xf32> to vector<8x32xf32>
    %279 = vector.extract_strided_slice %276 {offsets = [0, 64], sizes = [8, 32], strides = [1, 1]} : vector<8x128xf32> to vector<8x32xf32>
    %280 = vector.extract_strided_slice %275 {offsets = [0, 96], sizes = [8, 32], strides = [1, 1]} : vector<8x128xf32> to vector<8x32xf32>
    %281 = arith.mulf %278, %263 : vector<8x32xf32>
    %282 = arith.mulf %277, %279 : vector<8x32xf32>
    %283 = arith.addf %281, %282 : vector<8x32xf32>
    %284 = math.tanh %283 : vector<8x32xf32>
    %285 = arith.mulf %280, %284 : vector<8x32xf32>
    %286 = vector.extract_strided_slice %182 {offsets = [40, 0], sizes = [8, 128], strides = [1, 1]} : vector<64x128xf32> to vector<8x128xf32>
    %cst_81 = arith.constant dense<0.000000e+00> : vector<8x128xf32>
    %287 = tpu.matmul %285, %183, %cst_81 {dimension_numbers = #tpu.dot_dimension_numbers<[1], [0], [0], [1], [0, 0, 1, 1], [], []>} : vector<8x32xf32>, vector<32x128xf32>, vector<8x128xf32> -> vector<8x128xf32>
    %288 = arith.addf %286, %287 : vector<8x128xf32>
    %cst_82 = arith.constant 0.000000e+00 : f32
    %289 = vector.broadcast %cst_82 : f32 to vector<8x128xf32>
    %290 = arith.subf %289, %288 : vector<8x128xf32>
    %291 = math.exp %290 : vector<8x128xf32>
    %cst_83 = arith.constant 1.000000e+00 : f32
    %292 = vector.broadcast %cst_83 : f32 to vector<8x128xf32>
    %293 = arith.addf %292, %291 : vector<8x128xf32>
    %cst_84 = arith.constant 1.000000e+00 : f32
    %294 = vector.broadcast %cst_84 : f32 to vector<8x128xf32>
    %295 = arith.divf %294, %293 : vector<8x128xf32>
    %296 = math.tanh %288 : vector<8x128xf32>
    %297 = vector.extract_strided_slice %295 {offsets = [0, 0], sizes = [8, 32], strides = [1, 1]} : vector<8x128xf32> to vector<8x32xf32>
    %298 = vector.extract_strided_slice %295 {offsets = [0, 32], sizes = [8, 32], strides = [1, 1]} : vector<8x128xf32> to vector<8x32xf32>
    %299 = vector.extract_strided_slice %296 {offsets = [0, 64], sizes = [8, 32], strides = [1, 1]} : vector<8x128xf32> to vector<8x32xf32>
    %300 = vector.extract_strided_slice %295 {offsets = [0, 96], sizes = [8, 32], strides = [1, 1]} : vector<8x128xf32> to vector<8x32xf32>
    %301 = arith.mulf %298, %283 : vector<8x32xf32>
    %302 = arith.mulf %297, %299 : vector<8x32xf32>
    %303 = arith.addf %301, %302 : vector<8x32xf32>
    %304 = math.tanh %303 : vector<8x32xf32>
    %305 = arith.mulf %300, %304 : vector<8x32xf32>
    %306 = vector.extract_strided_slice %182 {offsets = [48, 0], sizes = [8, 128], strides = [1, 1]} : vector<64x128xf32> to vector<8x128xf32>
    %cst_85 = arith.constant dense<0.000000e+00> : vector<8x128xf32>
    %307 = tpu.matmul %305, %183, %cst_85 {dimension_numbers = #tpu.dot_dimension_numbers<[1], [0], [0], [1], [0, 0, 1, 1], [], []>} : vector<8x32xf32>, vector<32x128xf32>, vector<8x128xf32> -> vector<8x128xf32>
    %308 = arith.addf %306, %307 : vector<8x128xf32>
    %cst_86 = arith.constant 0.000000e+00 : f32
    %309 = vector.broadcast %cst_86 : f32 to vector<8x128xf32>
    %310 = arith.subf %309, %308 : vector<8x128xf32>
    %311 = math.exp %310 : vector<8x128xf32>
    %cst_87 = arith.constant 1.000000e+00 : f32
    %312 = vector.broadcast %cst_87 : f32 to vector<8x128xf32>
    %313 = arith.addf %312, %311 : vector<8x128xf32>
    %cst_88 = arith.constant 1.000000e+00 : f32
    %314 = vector.broadcast %cst_88 : f32 to vector<8x128xf32>
    %315 = arith.divf %314, %313 : vector<8x128xf32>
    %316 = math.tanh %308 : vector<8x128xf32>
    %317 = vector.extract_strided_slice %315 {offsets = [0, 0], sizes = [8, 32], strides = [1, 1]} : vector<8x128xf32> to vector<8x32xf32>
    %318 = vector.extract_strided_slice %315 {offsets = [0, 32], sizes = [8, 32], strides = [1, 1]} : vector<8x128xf32> to vector<8x32xf32>
    %319 = vector.extract_strided_slice %316 {offsets = [0, 64], sizes = [8, 32], strides = [1, 1]} : vector<8x128xf32> to vector<8x32xf32>
    %320 = vector.extract_strided_slice %315 {offsets = [0, 96], sizes = [8, 32], strides = [1, 1]} : vector<8x128xf32> to vector<8x32xf32>
    %321 = arith.mulf %318, %303 : vector<8x32xf32>
    %322 = arith.mulf %317, %319 : vector<8x32xf32>
    %323 = arith.addf %321, %322 : vector<8x32xf32>
    %324 = math.tanh %323 : vector<8x32xf32>
    %325 = arith.mulf %320, %324 : vector<8x32xf32>
    %326 = vector.extract_strided_slice %182 {offsets = [56, 0], sizes = [8, 128], strides = [1, 1]} : vector<64x128xf32> to vector<8x128xf32>
    %cst_89 = arith.constant dense<0.000000e+00> : vector<8x128xf32>
    %327 = tpu.matmul %325, %183, %cst_89 {dimension_numbers = #tpu.dot_dimension_numbers<[1], [0], [0], [1], [0, 0, 1, 1], [], []>} : vector<8x32xf32>, vector<32x128xf32>, vector<8x128xf32> -> vector<8x128xf32>
    %328 = arith.addf %326, %327 : vector<8x128xf32>
    %cst_90 = arith.constant 0.000000e+00 : f32
    %329 = vector.broadcast %cst_90 : f32 to vector<8x128xf32>
    %330 = arith.subf %329, %328 : vector<8x128xf32>
    %331 = math.exp %330 : vector<8x128xf32>
    %cst_91 = arith.constant 1.000000e+00 : f32
    %332 = vector.broadcast %cst_91 : f32 to vector<8x128xf32>
    %333 = arith.addf %332, %331 : vector<8x128xf32>
    %cst_92 = arith.constant 1.000000e+00 : f32
    %334 = vector.broadcast %cst_92 : f32 to vector<8x128xf32>
    %335 = arith.divf %334, %333 : vector<8x128xf32>
    %336 = math.tanh %328 : vector<8x128xf32>
    %337 = vector.extract_strided_slice %335 {offsets = [0, 0], sizes = [8, 32], strides = [1, 1]} : vector<8x128xf32> to vector<8x32xf32>
    %338 = vector.extract_strided_slice %335 {offsets = [0, 32], sizes = [8, 32], strides = [1, 1]} : vector<8x128xf32> to vector<8x32xf32>
    %339 = vector.extract_strided_slice %336 {offsets = [0, 64], sizes = [8, 32], strides = [1, 1]} : vector<8x128xf32> to vector<8x32xf32>
    %340 = vector.extract_strided_slice %335 {offsets = [0, 96], sizes = [8, 32], strides = [1, 1]} : vector<8x128xf32> to vector<8x32xf32>
    %341 = arith.mulf %338, %323 : vector<8x32xf32>
    %342 = arith.mulf %337, %339 : vector<8x32xf32>
    %343 = arith.addf %341, %342 : vector<8x32xf32>
    %344 = math.tanh %343 : vector<8x32xf32>
    %345 = arith.mulf %340, %344 : vector<8x32xf32>
    %c0_93 = arith.constant 0 : index
    %c0_94 = arith.constant 0 : index
    %346 = vector.load %arg7[%c0_93, %c0_94] : memref<32x16xf32, #tpu.memory_space<vmem>>, vector<32x16xf32>
    %cst_95 = arith.constant dense<0.000000e+00> : vector<8x16xf32>
    %347 = tpu.matmul %345, %346, %cst_95 {dimension_numbers = #tpu.dot_dimension_numbers<[1], [0], [0], [1], [0, 0, 1, 1], [], []>} : vector<8x32xf32>, vector<32x16xf32>, vector<8x16xf32> -> vector<8x16xf32>
    %c0_96 = arith.constant 0 : index
    %c0_97 = arith.constant 0 : index
    %348 = vector.load %arg8[%c0_96, %c0_97] : memref<1x16xf32, #tpu.memory_space<vmem>>, vector<1x16xf32>
    %349 = vector.broadcast %348 : vector<1x16xf32> to vector<8x16xf32>
    %350 = arith.addf %347, %349 : vector<8x16xf32>
    %c0_98 = arith.constant 0 : index
    %c0_99 = arith.constant 0 : index
    %351 = vector.load %arg9[%c0_98, %c0_99] : memref<8x16xf32, #tpu.memory_space<vmem>>, vector<8x16xf32>
    tpu.vector_store %arg9[%c0_98, %c0_99], %350 {strides = array<i32>} : memref<8x16xf32, #tpu.memory_space<vmem>>, vector<8x16xf32>,
    return
  }
}

</mosaic_0001>

<bundles_post_ra>
// kernel: tpu_custom_call.1
= control target key start
LH: loop header
LB: loop body
LE: loop exit
PB: predicated region body
PF: predicated region fallthrough
CT: control target
= control target key end

     0   :  { %vm49_vm0 = vcmask 64512   ;;  %v2679_v3 = vmov 0.0|0.0   ;;  %s3101_s0 = inlined_call_operand.vmem [shape: f32[64,8], index: 0, kind: input, shape index: {}]   ;;  %s3102_s1 = inlined_call_operand.vmem [shape: f32[8,128], index: 1, kind: input, shape index: {}]   ;;  %s3103_s2 = inlined_call_operand.vmem [shape: f32[32,128], index: 2, kind: input, shape index: {}]   ;;  %s3104_s3 = inlined_call_operand.vmem [shape: f32[1,128], index: 3, kind: input, shape index: {}]   ;;  %s3105_s4 = inlined_call_operand.vmem [shape: f32[32,128], index: 4, kind: input, shape index: {}]   ;;  %s3106_s5 = inlined_call_operand.vmem [shape: f32[32,128], index: 5, kind: input, shape index: {}]   ;;  %s3107_s6 = inlined_call_operand.vmem [shape: f32[1,128], index: 6, kind: input, shape index: {}]   ;;  %s3108_s7 = inlined_call_operand.vmem [shape: f32[32,16], index: 7, kind: input, shape index: {}]   ;;  %s3109_s8 = inlined_call_operand.vmem [shape: f32[1,16], index: 8, kind: input, shape index: {}]   ;;  %s3110_s9 = inlined_call_operand.hbm [shape: f32[8,16], index: 9, kind: output, shape index: {}]  }
   0x1   :  { %v179_v0 = vld [vmem:[%s3103_s2] sm:$0xff]  ;;  %v180_v1 = vld [vmem:[%s3103_s2 + $0x8] sm:$0xff]  ;;  %2411 = vmatprep.subr.bf16.mxu1 %v2679_v3  ;;  %v181_v7 = vld [vmem:[%s3103_s2 + $0x10] sm:$0xff] }
   0x2   :  { %v41_v2 = vld [vmem:[%s3102_s1] sm:$0xff]  ;;  %v2745_v4 = vpack.c.bf16 %v180_v1, %v179_v0  ;;  %v34_v6 = vld [vmem:[%s3101_s0 + $0x8] sm:$0xff]  ;;  %v182_v8 = vld [vmem:[%s3103_s2 + $0x18] sm:$0xff] }
   0x3   :  { %2190 = vmatprep.subr.mxu0 %v41_v2  ;;  %v33_v5 = vld [vmem:[%s3101_s0] sm:$0xff] }
   0x4   :  { %2191 = vmatpush3.msra.mxu0 %v41_v2  ;;  %2192 = vmatprep.mubr.msk.f32.mxu0 %vm49_vm0, %v33_v5 }
   0x5   :  { %14 = vsyncpa [#allocation4], 0  ;;  %2413 = vmatpush3.bf16.msra.mxu1 %v2745_v4  ;;  %2193 = vmatmul.mubr.msk.f32.vlgmr.msra.gmra.mrb[0].mxu0 %vm49_vm0, %v34_v6  ;;  %v2762_v9 = vpack.c.bf16 %v182_v8, %v181_v7  ;;  %vm2680_vm1 = vmmov 0   ;;  %v2681_v10 = vmov 0.0   ;;  %v2784_v12 = vld [vmem:[%s3104_s3] ss:$0 sm:$0xff] }
   0x6   :  { %2414 = vmatprep.subr.bf16.mxu1 %v2679_v3  ;;  %2212 = vmatprep.mubr.msk.f32.mxu1 %vm2680_vm1, %v2681_v10  ;;  %s2682_s23 = smov 64   ;;  %s2683_s3 = smov 32   ;;  %vm183_vm2 = vcmask 261120   ;;  %v35_v48 = vld [vmem:[%s3101_s0 + $0x10] sm:$0xff]  ;;  %v36_v49 = vld [vmem:[%s3101_s0 + $0x18] sm:$0xff]  ;;  %v37_v50 = vld [vmem:[%s3101_s0 + $0x20] sm:$0xff] }
   0x7   :  { %2423 = vmatprep.subr.bf16.mxu0 %v2679_v3  ;;  %2195 = vmatprep.mubr.msk.f32.mxu0 %vm49_vm0, %v35_v48  ;;  %v38_v51 = vld [vmem:[%s3101_s0 + $0x28] sm:$0xff]  ;;  %v39_v52 = vld [vmem:[%s3101_s0 + $0x30] sm:$0xff]  ;;  %v40_v53 = vld [vmem:[%s3101_s0 + $0x38] sm:$0xff]  ;;  %vm2034_vm3 = vcmask 130048  }
   0x8   :  { %2425 = vmatpush3.bf16.msra.mxu0 %v2745_v4 }
   0x9   :  { %2416 = vmatpush3.bf16.msra.mxu1 %v2762_v9  ;;  %2426 = vmatprep.subr.bf16.mxu0 %v2679_v3 }
   0xa   :  { %2417 = vmatprep.subr.bf16.mxu1 %v2679_v3  ;;  %2196 = vmatmul.mubr.msk.f32.gmra.mrb[2].mxu0 %vm49_vm0, %v36_v49 }
   0xb   :  { %2198 = vmatprep.mubr.msk.f32.mxu0 %vm49_vm0, %v37_v50 }
   0xc   :  { %2213 = vmatmul.mubr.f32.vlgmr.msra.gmra.mrb[0].mxu1 %v2681_v10  ;;  %2428 = vmatpush3.bf16.msra.mxu0 %v2762_v9 }
   0xd   :  { %2419 = vmatpush3.bf16.msra.mxu1 %v2745_v4  ;;  %2223 = vmatprep.mubr.msk.f32.mxu1 %vm2680_vm1, %v2681_v10 }
   0xe   :  { %2420 = vmatprep.subr.bf16.mxu1 %v2679_v3  ;;  %2435 = vmatprep.subr.bf16.mxu0 %v2679_v3 }
   0xf   :  { %2199 = vmatmul.mubr.msk.f32.gmra.mrb[4].mxu0 %vm49_vm0, %v38_v51 }
  0x10   :  { %2201 = vmatprep.mubr.msk.f32.mxu0 %vm49_vm0, %v39_v52 }
  0x11   :  { %2422 = vmatpush3.bf16.msra.mxu1 %v2762_v9 }
  0x12   :  { %2429 = vmatprep.subr.bf16.mxu1 %v2679_v3 }
  0x13   :  { %2202 = vmatmul.mubr.msk.f32.gmra.mrb[6].mxu0 %vm49_vm0, %v40_v53 }
  0x14   :  { %2234 = vmatprep.mubr.msk.f32.mxu0 %vm2680_vm1, %v2681_v10 }
  0xd8   :  { %v2194_v11 = vpop.f32.mrb[0].mxu0 }
  0xd9   :  { %v140_v13 = vpop.f32.mrb[1].mxu0  ;;  %v146_v33 = vadd.f32 %v2194_v11, %v2784_v12 }
  0xda   :  { %v141_v14 = vadd.f32 %v2784_v12, %v140_v13 }
  0xdd   :  { %v2197_v57 = vpop.f32.mrb[2].mxu0 }
  0xde   :  { %v150_v58 = vpop.f32.mrb[3].mxu0 }
  0xdf   :  { %v253_v15 = vpop.f32.mrb[0].mxu1  ;;  %v151_v0 = vadd.f32 %v2784_v12, %v150_v58 }
  0xe0   :  { %v257_v16 = vadd.f32 %v253_v15, %v141_v14  ;;  %v2214_v17 = vpop.f32.mrb[1].mxu1 }
  0xe2   :  { %2527 = vtanh.f32 %v257_v16  ;;  %v258_v19 = vsub.f32 0.0, %v257_v16  ;;  %v2830_v59 = vpop.f32.mrb[4].mxu0 }
  0xe3   :  { %v2832_v60 = vpop.f32.mrb[5].mxu0 }
  0xe4   :  { %v259_v20 = vmul.f32 1.442695, %v258_v19 }
  0xe6   :  { %2529 = vpow2.f32 %v259_v20  ;;  %v2834_v61 = vpop.f32.mrb[6].mxu0 }
  0xe7   :  { %v2836_v62 = vpop.f32.mrb[7].mxu0 }
  0xec   :  { %v2528_v18 = vpop.eup %2527 }
  0xed   :  { %267 = vrot.lane.b32.xlu0 %v2528_v18, %s2682_s23 }
  0xf0   :  { %v2530_v21 = vpop.eup %2529 }
  0xf1   :  { %v261_v22 = vadd.f32 1.0, %v2530_v21 }
  0xf3   :  { %2531 = vrcp.f32 %v261_v22 }
  0xfd   :  { %v2532_v23 = vpop.eup %2531 }
  0xfe   :  { %v265_v26 = vmul.f32 0.0, %v2532_v23 }
 0x15f   :  { %v268_v24 = vpop.permute.xlu0 %267 }
 0x160   :  { %v270_v25 = vmul.f32 %v2532_v23, %v268_v24  ;;  %v156_v24 = vadd.f32 %v2197_v57, %v2784_v12 }
 0x162   :  { %272 = vrot.lane.b32.xlu0 %v270_v25, %s2683_s3 }
 0x1d4   :  { %v273_v27 = vpop.permute.xlu0 %272 }
 0x1d5   :  { %v275_v28 = vadd.f32 %v273_v27, %v265_v26 }
 0x1d7   :  { %2533 = vtanh.f32 %v275_v28 }
 0x1e1   :  { %v2534_v29 = vpop.eup %2533 }
 0x1e2   :  { %278 = vrot.lane.b32.xlu1 %v2534_v29, %s2682_s23 }
 0x254   :  { %v279_v30 = vpop.permute.xlu1 %278 }
 0x255   :  { %v281_v31 = vmul.f32 %v2532_v23, %v279_v30 }
 0x257   :  { %283 = vrot.lane.b32.xlu1 %v281_v31, %s2683_s3 }
 0x2c9   :  { %v284_v32 = vpop.permute.xlu1 %283 }
 0x2ca   :  { %286 = vst.msk [vmem:[#allocation2] sm:$0xff] %vm183_vm2, %v284_v32  ;;  %2224 = vmatmul.mubr.msk.f32.vlgmr.msra.gmra.mrb[2].mxu1 %vm183_vm2, %v284_v32 }
 0x2cb   :  { %2431 = vmatpush3.bf16.msra.mxu1 %v2745_v4  ;;  %2245 = vmatprep.mubr.msk.f32.mxu1 %vm2680_vm1, %v2681_v10 }
 0x2cc   :  { %2432 = vmatprep.subr.bf16.mxu1 %v2679_v3 }
 0x2cf   :  { %2434 = vmatpush3.bf16.msra.mxu1 %v2762_v9 }
 0x2d0   :  { %2441 = vmatprep.subr.bf16.mxu1 %v2679_v3 }
 0x39d   :  { %v355_v34 = vpop.f32.mrb[2].mxu1 }
 0x39e   :  { %v359_v35 = vadd.f32 %v355_v34, %v146_v33  ;;  %v2225_v36 = vpop.f32.mrb[3].mxu1 }
 0x3a0   :  { %2535 = vtanh.f32 %v359_v35  ;;  %v360_v38 = vsub.f32 0.0, %v359_v35 }
 0x3a2   :  { %v361_v39 = vmul.f32 1.442695, %v360_v38 }
 0x3a4   :  { %2537 = vpow2.f32 %v361_v39 }
 0x3aa   :  { %v2536_v37 = vpop.eup %2535 }
 0x3ab   :  { %369 = vrot.lane.b32.xlu0 %v2536_v37, %s2682_s23 }
 0x3ae   :  { %v2538_v40 = vpop.eup %2537 }
 0x3af   :  { %v363_v41 = vadd.f32 1.0, %v2538_v40 }
 0x3b1   :  { %2539 = vrcp.f32 %v363_v41 }
 0x3bb   :  { %v2540_v42 = vpop.eup %2539 }
 0x3bc   :  { %v367_v45 = vmul.f32 %v2540_v42, %v275_v28 }
 0x41d   :  { %v370_v43 = vpop.permute.xlu0 %369 }
 0x41e   :  { %v372_v44 = vmul.f32 %v2540_v42, %v370_v43  ;;  %v161_v43 = vadd.f32 %v2784_v12, %v2832_v60 }
 0x420   :  { %374 = vrot.lane.b32.xlu1 %v372_v44, %s2683_s3 }
 0x492   :  { %v375_v46 = vpop.permute.xlu1 %374 }
 0x493   :  { %v377_v47 = vadd.f32 %v375_v46, %v367_v45 }
 0x495   :  { %2541 = vtanh.f32 %v377_v47 }
 0x49f   :  { %v2542_v54 = vpop.eup %2541 }
 0x4a0   :  { %380 = vrot.lane.b32.xlu0 %v2542_v54, %s2682_s23 }
 0x512   :  { %v381_v55 = vpop.permute.xlu0 %380 }
 0x513   :  { %v383_v56 = vmul.f32 %v2540_v42, %v381_v55 }
 0x515   :  { %385 = vrot.lane.b32.xlu1 %v383_v56, %s2683_s3 }
 0x587   :  { %v386_v63 = vpop.permute.xlu1 %385 }
 0x588   :  { %388 = vst.msk [vmem:[#allocation2 + $0x8] sm:$0xff] %vm183_vm2, %v386_v63  ;;  %2235 = vmatmul.mubr.msk.f32.vlgmr.msra.gmra.mrb[8].mxu0 %vm183_vm2, %v386_v63 }
 0x589   :  { %2437 = vmatpush3.bf16.msra.mxu0 %v2745_v4  ;;  %2256 = vmatprep.mubr.msk.f32.mxu0 %vm2680_vm1, %v2681_v10 }
 0x58a   :  { %2438 = vmatprep.subr.bf16.mxu0 %v2679_v3 }
 0x58d   :  { %2440 = vmatpush3.bf16.msra.mxu0 %v2762_v9 }
 0x58e   :  { %2447 = vmatprep.subr.bf16.mxu0 %v2679_v3 }
 0x65b   :  { %v457_v1 = vpop.f32.mrb[8].mxu0 }
 0x65c   :  { %v461_v2 = vadd.f32 %v457_v1, %v151_v0  ;;  %v2236_v5 = vpop.f32.mrb[9].mxu0  ;;  %v166_v1 = vadd.f32 %v2830_v59, %v2784_v12 }
 0x65e   :  { %2543 = vtanh.f32 %v461_v2  ;;  %v462_v7 = vsub.f32 0.0, %v461_v2 }
 0x660   :  { %v463_v8 = vmul.f32 1.442695, %v462_v7 }
 0x662   :  { %2545 = vpow2.f32 %v463_v8 }
 0x668   :  { %v2544_v6 = vpop.eup %2543 }
 0x669   :  { %471 = vrot.lane.b32.xlu0 %v2544_v6, %s2682_s23 }
 0x66c   :  { %v2546_v11 = vpop.eup %2545 }
 0x66d   :  { %v465_v13 = vadd.f32 1.0, %v2546_v11 }
 0x66f   :  { %2547 = vrcp.f32 %v465_v13 }
 0x679   :  { %v2548_v14 = vpop.eup %2547 }
 0x67a   :  { %v469_v17 = vmul.f32 %v2548_v14, %v377_v47 }
 0x6db   :  { %v472_v15 = vpop.permute.xlu0 %471 }
 0x6dc   :  { %v474_v16 = vmul.f32 %v2548_v14, %v472_v15 }
 0x6de   :  { %476 = vrot.lane.b32.xlu1 %v474_v16, %s2683_s3 }
 0x750   :  { %v477_v18 = vpop.permute.xlu1 %476 }
 0x751   :  { %v479_v19 = vadd.f32 %v477_v18, %v469_v17  ;;  %v1009_v18 = vld [vmem:[%s3105_s4] sm:$0xff] }
 0x753   :  { %2549 = vtanh.f32 %v479_v19 }
 0x75d   :  { %v2550_v20 = vpop.eup %2549 }
 0x75e   :  { %482 = vrot.lane.b32.xlu0 %v2550_v20, %s2682_s23 }
 0x7d0   :  { %v483_v21 = vpop.permute.xlu0 %482 }
 0x7d1   :  { %v485_v22 = vmul.f32 %v2548_v14, %v483_v21 }
 0x7d3   :  { %487 = vrot.lane.b32.xlu1 %v485_v22, %s2683_s3 }
 0x845   :  { %v488_v23 = vpop.permute.xlu1 %487 }
 0x846   :  { %490 = vst.msk [vmem:[#allocation2 + $0x10] sm:$0xff] %vm183_vm2, %v488_v23  ;;  %2246 = vmatmul.mubr.msk.f32.vlgmr.msra.gmra.mrb[4].mxu1 %vm183_vm2, %v488_v23 }
 0x847   :  { %2443 = vmatpush3.bf16.msra.mxu1 %v2745_v4  ;;  %2267 = vmatprep.mubr.msk.f32.mxu1 %vm2680_vm1, %v2681_v10 }
 0x848   :  { %2444 = vmatprep.subr.bf16.mxu1 %v2679_v3 }
 0x84b   :  { %2446 = vmatpush3.bf16.msra.mxu1 %v2762_v9 }
 0x84c   :  { %2453 = vmatprep.subr.bf16.mxu1 %v2679_v3 }
 0x919   :  { %v559_v25 = vpop.f32.mrb[4].mxu1 }
 0x91a   :  { %v563_v26 = vadd.f32 %v559_v25, %v156_v24  ;;  %v2247_v27 = vpop.f32.mrb[5].mxu1  ;;  %v1011_v24 = vld [vmem:[%s3105_s4 + $0x10] sm:$0xff]  ;;  %v1012_v25 = vld [vmem:[%s3105_s4 + $0x18] sm:$0xff] }
 0x91c   :  { %2551 = vtanh.f32 %v563_v26  ;;  %v564_v29 = vsub.f32 0.0, %v563_v26  ;;  %v2463_v26 = vpack.c.bf16 %v1012_v25, %v1011_v24 }
 0x91e   :  { %v565_v30 = vmul.f32 1.442695, %v564_v29  ;;  %v1002_v29 = vld [vmem:[#allocation2 + $0x8] sm:$0xff] }
 0x920   :  { %2553 = vpow2.f32 %v565_v30  ;;  %v1003_v30 = vld [vmem:[#allocation2 + $0x10] sm:$0xff] }
 0x926   :  { %v2552_v28 = vpop.eup %2551 }
 0x927   :  { %573 = vrot.lane.b32.xlu0 %v2552_v28, %s2682_s23  ;;  %v1001_v28 = vld [vmem:[#allocation2] sm:$0xff] }
 0x92a   :  { %v2554_v31 = vpop.eup %2553 }
 0x92b   :  { %v567_v32 = vadd.f32 1.0, %v2554_v31 }
 0x92d   :  { %2555 = vrcp.f32 %v567_v32 }
 0x937   :  { %v2556_v33 = vpop.eup %2555 }
 0x938   :  { %v571_v36 = vmul.f32 %v2556_v33, %v479_v19  ;;  %v1010_v19 = vld [vmem:[%s3105_s4 + $0x8] sm:$0xff] }
 0x939   :  { %v2459_v20 = vpack.c.bf16 %v1010_v19, %v1009_v18 }
 0x999   :  { %v574_v34 = vpop.permute.xlu0 %573 }
 0x99a   :  { %v576_v35 = vmul.f32 %v2556_v33, %v574_v34  ;;  %v171_v34 = vadd.f32 %v2784_v12, %v2836_v62 }
 0x99c   :  { %578 = vrot.lane.b32.xlu1 %v576_v35, %s2683_s3 }
 0xa0e   :  { %v579_v37 = vpop.permute.xlu1 %578 }
 0xa0f   :  { %v581_v38 = vadd.f32 %v579_v37, %v571_v36 }
 0xa11   :  { %2557 = vtanh.f32 %v581_v38 }
 0xa1b   :  { %v2558_v39 = vpop.eup %2557 }
 0xa1c   :  { %584 = vrot.lane.b32.xlu0 %v2558_v39, %s2682_s23 }
 0xa8e   :  { %v585_v40 = vpop.permute.xlu0 %584 }
 0xa8f   :  { %v587_v41 = vmul.f32 %v2556_v33, %v585_v40 }
 0xa91   :  { %589 = vrot.lane.b32.xlu1 %v587_v41, %s2683_s3 }
 0xb03   :  { %v590_v42 = vpop.permute.xlu1 %589 }
 0xb04   :  { %592 = vst.msk [vmem:[#allocation2 + $0x18] sm:$0xff] %vm183_vm2, %v590_v42  ;;  %2257 = vmatmul.mubr.msk.f32.vlgmr.msra.gmra.mrb[10].mxu0 %vm183_vm2, %v590_v42 }
 0xb05   :  { %2449 = vmatpush3.bf16.msra.mxu0 %v2745_v4  ;;  %2278 = vmatprep.mubr.msk.f32.mxu0 %vm2680_vm1, %v2681_v10 }
 0xb06   :  { %2450 = vmatprep.subr.bf16.mxu0 %v2679_v3 }
 0xb09   :  { %2452 = vmatpush3.bf16.msra.mxu0 %v2762_v9 }
 0xb0a   :  { %2460 = vmatprep.subr.bf16.mxu0 %v2459_v20 }
 0xb0b   :  { %v1004_v31 = vld [vmem:[#allocation2 + $0x18] sm:$0xff] }
 0xbd7   :  { %v661_v44 = vpop.f32.mrb[10].mxu0 }
 0xbd8   :  { %v665_v45 = vadd.f32 %v661_v44, %v161_v43  ;;  %v2258_v46 = vpop.f32.mrb[11].mxu0 }
 0xbda   :  { %2559 = vtanh.f32 %v665_v45  ;;  %v666_v48 = vsub.f32 0.0, %v665_v45 }
 0xbdc   :  { %v667_v49 = vmul.f32 1.442695, %v666_v48 }
 0xbde   :  { %2561 = vpow2.f32 %v667_v49 }
 0xbe4   :  { %v2560_v47 = vpop.eup %2559 }
 0xbe5   :  { %675 = vrot.lane.b32.xlu0 %v2560_v47, %s2682_s23 }
 0xbe8   :  { %v2562_v50 = vpop.eup %2561 }
 0xbe9   :  { %v669_v51 = vadd.f32 1.0, %v2562_v50 }
 0xbeb   :  { %2563 = vrcp.f32 %v669_v51 }
 0xbf5   :  { %v2564_v52 = vpop.eup %2563 }
 0xbf6   :  { %v673_v55 = vmul.f32 %v2564_v52, %v581_v38 }
 0xc57   :  { %v676_v53 = vpop.permute.xlu0 %675 }
 0xc58   :  { %v678_v54 = vmul.f32 %v2564_v52, %v676_v53 }
 0xc5a   :  { %680 = vrot.lane.b32.xlu1 %v678_v54, %s2683_s3 }
 0xccc   :  { %v681_v56 = vpop.permute.xlu1 %680 }
 0xccd   :  { %v683_v57 = vadd.f32 %v681_v56, %v673_v55  ;;  %v1149_v55 = vld [vmem:[%s3106_s5] sm:$0xff]  ;;  %v1150_v56 = vld [vmem:[%s3106_s5 + $0x8] sm:$0xff] }
 0xccf   :  { %2565 = vtanh.f32 %v683_v57 }
 0xcd9   :  { %v2566_v58 = vpop.eup %2565 }
 0xcda   :  { %686 = vrot.lane.b32.xlu0 %v2566_v58, %s2682_s23  ;;  %v1151_v58 = vld [vmem:[%s3106_s5 + $0x10] sm:$0xff] }
 0xd4c   :  { %v687_v60 = vpop.permute.xlu0 %686 }
 0xd4d   :  { %v689_v63 = vmul.f32 %v2564_v52, %v687_v60  ;;  %v1152_v60 = vld [vmem:[%s3106_s5 + $0x18] sm:$0xff] }
 0xd4f   :  { %691 = vrot.lane.b32.xlu1 %v689_v63, %s2683_s3  ;;  %v2946_v63 = vpack.c.bf16 %v1152_v60, %v1151_v58 }
 0xdc1   :  { %v692_v0 = vpop.permute.xlu1 %691 }
 0xdc2   :  { %694 = vst.msk [vmem:[#allocation2 + $0x20] sm:$0xff] %vm183_vm2, %v692_v0  ;;  %2268 = vmatmul.mubr.msk.f32.vlgmr.msra.gmra.mrb[6].mxu1 %vm183_vm2, %v692_v0 }
 0xdc3   :  { %2455 = vmatpush3.bf16.msra.mxu1 %v2745_v4  ;;  %2289 = vmatprep.mubr.msk.f32.mxu1 %vm2680_vm1, %v2681_v10 }
 0xdc4   :  { %2456 = vmatprep.subr.bf16.mxu1 %v2679_v3 }
 0xdc7   :  { %2458 = vmatpush3.bf16.msra.mxu1 %v2762_v9 }
 0xdc8   :  { %2467 = vmatprep.subr.bf16.mxu1 %v2679_v3 }
 0xdc9   :  { %v1005_v32 = vld [vmem:[#allocation2 + $0x20] sm:$0xff] }
 0xe95   :  { %v763_v2 = vpop.f32.mrb[6].mxu1 }
 0xe96   :  { %v767_v5 = vadd.f32 %v763_v2, %v166_v1  ;;  %v2269_v6 = vpop.f32.mrb[7].mxu1 }
 0xe97   :  { %v176_v6 = vadd.f32 %v2834_v61, %v2784_v12 }
 0xe98   :  { %2567 = vtanh.f32 %v767_v5  ;;  %v768_v4 = vsub.f32 0.0, %v767_v5 }
 0xe9a   :  { %v769_v8 = vmul.f32 1.442695, %v768_v4 }
 0xe9c   :  { %2569 = vpow2.f32 %v769_v8 }
 0xea2   :  { %v2568_v7 = vpop.eup %2567 }
 0xea3   :  { %777 = vrot.lane.b32.xlu0 %v2568_v7, %s2682_s23 }
 0xea6   :  { %v2570_v11 = vpop.eup %2569 }
 0xea7   :  { %v771_v13 = vadd.f32 1.0, %v2570_v11  ;;  %v2972_v11 = vld [vmem:[%s3107_s6] ss:$0 sm:$0xff] }
 0xea9   :  { %2571 = vrcp.f32 %v771_v13 }
 0xeb3   :  { %v2572_v14 = vpop.eup %2571 }
 0xeb4   :  { %v775_v16 = vmul.f32 %v2572_v14, %v683_v57  ;;  %v2936_v57 = vpack.c.bf16 %v1150_v56, %v1149_v55 }
 0xf15   :  { %v778_v9 = vpop.permute.xlu0 %777 }
 0xf16   :  { %v780_v15 = vmul.f32 %v2572_v14, %v778_v9 }
 0xf18   :  { %782 = vrot.lane.b32.xlu1 %v780_v15, %s2683_s3 }
 0xf8a   :  { %v783_v59 = vpop.permute.xlu1 %782 }
 0xf8b   :  { %v785_v17 = vadd.f32 %v783_v59, %v775_v16 }
 0xf8d   :  { %2573 = vtanh.f32 %v785_v17 }
 0xf97   :  { %v2574_v21 = vpop.eup %2573 }
 0xf98   :  { %788 = vrot.lane.b32.xlu0 %v2574_v21, %s2682_s23 }
0x100a   :  { %v789_v22 = vpop.permute.xlu0 %788 }
0x100b   :  { %v791_v23 = vmul.f32 %v2572_v14, %v789_v22 }
0x100d   :  { %793 = vrot.lane.b32.xlu1 %v791_v23, %s2683_s3 }
0x107f   :  { %v794_v27 = vpop.permute.xlu1 %793 }
0x1080   :  { %796 = vst.msk [vmem:[#allocation2 + $0x28] sm:$0xff] %vm183_vm2, %v794_v27  ;;  %2279 = vmatmul.mubr.msk.f32.vlgmr.msra.gmra.mrb[12].mxu0 %vm183_vm2, %v794_v27 }
0x1081   :  { %2462 = vmatpush3.bf16.msra.mxu0 %v2459_v20  ;;  %2300 = vmatprep.mubr.msk.f32.mxu0 %vm183_vm2, %v1001_v28 }
0x1082   :  { %2464 = vmatprep.subr.bf16.mxu0 %v2463_v26 }
0x1085   :  { %2466 = vmatpush3.bf16.msra.mxu0 %v2463_v26 }
0x1086   :  { %2479 = vmatprep.subr.bf16.mxu0 %v2679_v3 }
0x1087   :  { %v1006_v33 = vld [vmem:[#allocation2 + $0x28] sm:$0xff] }
0x1088   :  { %2301 = vmatmul.mubr.msk.f32.vlgmr.msra.gmra.mrb[14].mxu0 %vm183_vm2, %v1002_v29 }
0x1089   :  { %2303 = vmatprep.mubr.msk.f32.mxu0 %vm183_vm2, %v1003_v30  ;;  %2481 = vmatpush3.bf16.msra.mxu0 %v2936_v57 }
0x108a   :  { %2482 = vmatprep.subr.bf16.mxu0 %v2679_v3 }
0x108c   :  { %2304 = vmatmul.mubr.msk.f32.gmra.mrb[16].mxu0 %vm183_vm2, %v1004_v31 }
0x108d   :  { %2306 = vmatprep.mubr.msk.f32.mxu0 %vm183_vm2, %v1005_v32  ;;  %2484 = vmatpush3.bf16.msra.mxu0 %v2946_v63 }
0x108e   :  { %2491 = vmatprep.subr.bf16.mxu0 %v2679_v3 }
0x1090   :  { %2307 = vmatmul.mubr.msk.f32.gmra.mrb[18].mxu0 %vm183_vm2, %v1006_v33 }
0x1153   :  { %v865_v35 = vpop.f32.mrb[12].mxu0 }
0x1154   :  { %v869_v36 = vadd.f32 %v865_v35, %v171_v34  ;;  %v2280_v37 = vpop.f32.mrb[13].mxu0 }
0x1156   :  { %2575 = vtanh.f32 %v869_v36  ;;  %v870_v45 = vsub.f32 0.0, %v869_v36 }
0x1158   :  { %v871_v62 = vmul.f32 1.442695, %v870_v45 }
0x115a   :  { %2577 = vpow2.f32 %v871_v62 }
0x115b   :  { %v2914_v38 = vpop.f32.mrb[14].mxu0 }
0x115c   :  { %v1110_v39 = vpop.f32.mrb[15].mxu0 }
0x115d   :  { %v1111_v13 = vadd.f32 %v2972_v11, %v1110_v39 }
0x115f   :  { %v2916_v40 = vpop.f32.mrb[16].mxu0 }
0x1160   :  { %v2576_v41 = vpop.eup %2575  ;;  %v2918_v42 = vpop.f32.mrb[17].mxu0 }
0x1161   :  { %879 = vrot.lane.b32.xlu0 %v2576_v41, %s2682_s23 }
0x1163   :  { %v2921_v43 = vpop.f32.mrb[18].mxu0 }
0x1164   :  { %v2923_v44 = vpop.f32.mrb[19].mxu0  ;;  %v2578_v46 = vpop.eup %2577 }
0x1165   :  { %v873_v47 = vadd.f32 1.0, %v2578_v46  ;;  %v1116_v46 = vadd.f32 %v2914_v38, %v2972_v11 }
0x1167   :  { %2579 = vrcp.f32 %v873_v47 }
0x1171   :  { %v2580_v48 = vpop.eup %2579 }
0x1172   :  { %v877_v51 = vmul.f32 %v2580_v48, %v785_v17 }
0x11d3   :  { %v880_v49 = vpop.permute.xlu0 %879 }
0x11d4   :  { %v882_v50 = vmul.f32 %v2580_v48, %v880_v49 }
0x11d6   :  { %884 = vrot.lane.b32.xlu1 %v882_v50, %s2683_s3 }
0x1248   :  { %v885_v52 = vpop.permute.xlu1 %884 }
0x1249   :  { %v2926_v53 = vadd.f32 %v885_v52, %v877_v51 }
0x124b   :  { %2581 = vtanh.f32 %v2926_v53 }
0x1255   :  { %v2582_v54 = vpop.eup %2581 }
0x1256   :  { %890 = vrot.lane.b32.xlu0 %v2582_v54, %s2682_s23 }
0x12c8   :  { %v891_v0 = vpop.permute.xlu0 %890 }
0x12c9   :  { %v893_v1 = vmul.f32 %v2580_v48, %v891_v0 }
0x12cb   :  { %895 = vrot.lane.b32.xlu1 %v893_v1, %s2683_s3 }
0x133d   :  { %v896_v2 = vpop.permute.xlu1 %895 }
0x133e   :  { %898 = vst.msk [vmem:[#allocation2 + $0x30] sm:$0xff] %vm183_vm2, %v896_v2  ;;  %2290 = vmatmul.mubr.msk.f32.vlgmr.msra.gmra.mrb[8].mxu1 %vm183_vm2, %v896_v2 }
0x133f   :  { %2469 = vmatpush3.bf16.msra.mxu1 %v2936_v57  ;;  %2320 = vmatprep.mubr.msk.f32.mxu1 %vm2680_vm1, %v2681_v10 }
0x1340   :  { %2470 = vmatprep.subr.bf16.mxu1 %v2679_v3 }
0x1343   :  { %2472 = vmatpush3.bf16.msra.mxu1 %v2946_v63 }
0x1344   :  { %2473 = vmatprep.subr.bf16.mxu1 %v2679_v3 }
0x1345   :  { %v1007_v5 = vld [vmem:[#allocation2 + $0x30] sm:$0xff] }
0x1346   :  { %2321 = vmatmul.mubr.f32.vlgmr.msra.gmra.mrb[10].mxu1 %v2681_v10  ;;  %2309 = vmatprep.mubr.msk.f32.mxu0 %vm183_vm2, %v1007_v5 }
0x1347   :  { %2475 = vmatpush3.bf16.msra.mxu1 %v2936_v57  ;;  %2331 = vmatprep.mubr.msk.f32.mxu1 %vm2680_vm1, %v2681_v10 }
0x1348   :  { %2476 = vmatprep.subr.bf16.mxu1 %v2679_v3 }
0x134b   :  { %2478 = vmatpush3.bf16.msra.mxu1 %v2946_v63 }
0x134c   :  { %2485 = vmatprep.subr.bf16.mxu1 %v2679_v3 }
0x1411   :  { %v967_v7 = vpop.f32.mrb[8].mxu1 }
0x1412   :  { %v971_v4 = vadd.f32 %v967_v7, %v176_v6  ;;  %v2291_v8 = vpop.f32.mrb[9].mxu1 }
0x1414   :  { %v972_v26 = vsub.f32 0.0, %v971_v4 }
0x1416   :  { %v973_v27 = vmul.f32 1.442695, %v972_v26 }
0x1419   :  { %v1219_v14 = vpop.f32.mrb[10].mxu1 }
0x141a   :  { %v1223_v9 = vadd.f32 %v1219_v14, %v1111_v13  ;;  %v2322_v15 = vpop.f32.mrb[11].mxu1  ;;  %v1121_v14 = vadd.f32 %v2972_v11, %v2918_v42 }
0x141c   :  { %2583 = vtanh.f32 %v1223_v9  ;;  %v1224_v59 = vsub.f32 0.0, %v1223_v9 }
0x141e   :  { %v1225_v17 = vmul.f32 1.442695, %v1224_v59 }
0x1420   :  { %2585 = vpow2.f32 %v1225_v17 }
0x1426   :  { %v2584_v16 = vpop.eup %2583 }
0x1427   :  { %1233 = vrot.lane.b32.xlu0 %v2584_v16, %s2682_s23 }
0x142a   :  { %v2586_v12 = vpop.eup %2585 }
0x142b   :  { %v1227_v61 = vadd.f32 1.0, %v2586_v12 }
0x142d   :  { %2587 = vrcp.f32 %v1227_v61 }
0x1437   :  { %v2588_v18 = vpop.eup %2587 }
0x1438   :  { %v1231_v21 = vmul.f32 0.0, %v2588_v18 }
0x1499   :  { %v1234_v19 = vpop.permute.xlu0 %1233 }
0x149a   :  { %v1236_v20 = vmul.f32 %v2588_v18, %v1234_v19 }
0x149c   :  { %1238 = vrot.lane.b32.xlu1 %v1236_v20, %s2683_s3 }
0x150e   :  { %v1239_v22 = vpop.permute.xlu1 %1238 }
0x150f   :  { %v1241_v23 = vadd.f32 %v1239_v22, %v1231_v21 }
0x1511   :  { %2589 = vtanh.f32 %v1241_v23 }
0x1512   :  { %2591 = vtanh.f32 %v971_v4 }
0x1513   :  { %2593 = vpow2.f32 %v973_v27 }
0x151b   :  { %v2590_v24 = vpop.eup %2589 }
0x151c   :  { %1244 = vrot.lane.b32.xlu0 %v2590_v24, %s2682_s23  ;;  %v2592_v25 = vpop.eup %2591 }
0x151d   :  { %v2594_v28 = vpop.eup %2593 }
0x151e   :  { %v975_v29 = vadd.f32 1.0, %v2594_v28  ;;  %v1126_v28 = vadd.f32 %v2916_v40, %v2972_v11 }
0x1520   :  { %981 = vrot.lane.b32.xlu0 %v2592_v25, %s2682_s23  ;;  %2595 = vrcp.f32 %v975_v29 }
0x152a   :  { %v2596_v32 = vpop.eup %2595 }
0x152b   :  { %v979_v36 = vmul.f32 %v2596_v32, %v2926_v53 }
0x158e   :  { %v1245_v30 = vpop.permute.xlu0 %1244 }
0x158f   :  { %v1247_v31 = vmul.f32 %v2588_v18, %v1245_v30 }
0x1591   :  { %1249 = vrot.lane.b32.xlu1 %v1247_v31, %s2683_s3 }
0x1592   :  { %v982_v33 = vpop.permute.xlu0 %981 }
0x1593   :  { %v984_v34 = vmul.f32 %v2596_v32, %v982_v33 }
0x1595   :  { %986 = vrot.lane.b32.xlu0 %v984_v34, %s2683_s3 }
0x1603   :  { %v1250_v35 = vpop.permute.xlu1 %1249 }
0x1604   :  { %2332 = vmatmul.mubr.msk.f32.vlgmr.msra.gmra.mrb[12].mxu1 %vm183_vm2, %v1250_v35 }
0x1605   :  { %2487 = vmatpush3.bf16.msra.mxu1 %v2936_v57  ;;  %2353 = vmatprep.mubr.msk.f32.mxu1 %vm2680_vm1, %v2681_v10 }
0x1606   :  { %2488 = vmatprep.subr.bf16.mxu1 %v2679_v3 }
0x1607   :  { %v987_v37 = vpop.permute.xlu0 %986 }
0x1608   :  { %v989_v39 = vadd.f32 %v987_v37, %v979_v36 }
0x1609   :  { %2490 = vmatpush3.bf16.msra.mxu1 %v2946_v63 }
0x160a   :  { %2597 = vtanh.f32 %v989_v39  ;;  %2497 = vmatprep.subr.bf16.mxu1 %v2679_v3 }
0x1614   :  { %v2598_v41 = vpop.eup %2597 }
0x1615   :  { %992 = vrot.lane.b32.xlu0 %v2598_v41, %s2682_s23 }
0x1687   :  { %v993_v45 = vpop.permute.xlu0 %992 }
0x1688   :  { %v995_v62 = vmul.f32 %v2596_v32, %v993_v45 }
0x168a   :  { %997 = vrot.lane.b32.xlu0 %v995_v62, %s2683_s3 }
0x16d7   :  { %v1319_v47 = vpop.f32.mrb[12].mxu1 }
0x16d8   :  { %v1323_v48 = vadd.f32 %v1319_v47, %v1116_v46  ;;  %v2333_v49 = vpop.f32.mrb[13].mxu1 }
0x16da   :  { %2599 = vtanh.f32 %v1323_v48  ;;  %v1324_v53 = vsub.f32 0.0, %v1323_v48 }
0x16dc   :  { %v1325_v54 = vmul.f32 1.442695, %v1324_v53 }
0x16de   :  { %2601 = vpow2.f32 %v1325_v54 }
0x16e4   :  { %v2600_v50 = vpop.eup %2599 }
0x16e5   :  { %1333 = vrot.lane.b32.xlu1 %v2600_v50, %s2682_s23  ;;  %v1131_v50 = vadd.f32 %v2972_v11, %v2923_v44 }
0x16e8   :  { %v2602_v38 = vpop.eup %2601 }
0x16e9   :  { %v1327_v55 = vadd.f32 1.0, %v2602_v38 }
0x16eb   :  { %2603 = vrcp.f32 %v1327_v55 }
0x16f5   :  { %v2604_v56 = vpop.eup %2603 }
0x16f6   :  { %v1331_v0 = vmul.f32 %v2604_v56, %v1241_v23 }
0x16fc   :  { %v998_v51 = vpop.permute.xlu0 %997 }
0x16fd   :  { %1000 = vst.msk [vmem:[#allocation2 + $0x38] sm:$0xff] %vm183_vm2, %v998_v51 }
0x1704   :  { %v1008_v52 = vld [vmem:[#allocation2 + $0x38] sm:$0xff] }
0x1705   :  { %2310 = vmatmul.mubr.msk.f32.gmra.mrb[20].mxu0 %vm183_vm2, %v1008_v52 }
0x1706   :  { %2342 = vmatprep.mubr.msk.f32.mxu0 %vm2680_vm1, %v2681_v10 }
0x1757   :  { %v1334_v58 = vpop.permute.xlu1 %1333 }
0x1758   :  { %v1336_v60 = vmul.f32 %v2604_v56, %v1334_v58 }
0x175a   :  { %1338 = vrot.lane.b32.xlu1 %v1336_v60, %s2683_s3 }
0x17cc   :  { %v1339_v1 = vpop.permute.xlu1 %1338 }
0x17cd   :  { %v1341_v2 = vadd.f32 %v1339_v1, %v1331_v0 }
0x17cf   :  { %2605 = vtanh.f32 %v1341_v2 }
0x17d8   :  { %v2999_v5 = vpop.f32.mrb[20].mxu0 }
0x17d9   :  { %v2606_v6 = vpop.eup %2605  ;;  %v3001_v7 = vpop.f32.mrb[21].mxu0 }
0x17da   :  { %1344 = vrot.lane.b32.xlu1 %v2606_v6, %s2682_s23 }
0x184c   :  { %v1345_v4 = vpop.permute.xlu1 %1344 }
0x184d   :  { %v1347_v8 = vmul.f32 %v2604_v56, %v1345_v4 }
0x184f   :  { %1349 = vrot.lane.b32.xlu1 %v1347_v8, %s2683_s3 }
0x18c1   :  { %v1350_v13 = vpop.permute.xlu1 %1349 }
0x18c2   :  { %2343 = vmatmul.mubr.msk.f32.vlgmr.msra.gmra.mrb[22].mxu0 %vm183_vm2, %v1350_v13 }
0x18c3   :  { %2493 = vmatpush3.bf16.msra.mxu0 %v2936_v57  ;;  %2364 = vmatprep.mubr.msk.f32.mxu0 %vm2680_vm1, %v2681_v10 }
0x18c4   :  { %2494 = vmatprep.subr.bf16.mxu0 %v2679_v3 }
0x18c7   :  { %2496 = vmatpush3.bf16.msra.mxu0 %v2946_v63 }
0x18c8   :  { %2503 = vmatprep.subr.bf16.mxu0 %v2679_v3 }
0x1995   :  { %v1419_v9 = vpop.f32.mrb[22].mxu0 }
0x1996   :  { %v1423_v15 = vadd.f32 %v1419_v9, %v1121_v14  ;;  %v2344_v16 = vpop.f32.mrb[23].mxu0  ;;  %v1136_v9 = vadd.f32 %v2921_v43, %v2972_v11 }
0x1998   :  { %2607 = vtanh.f32 %v1423_v15  ;;  %v1424_v17 = vsub.f32 0.0, %v1423_v15 }
0x199a   :  { %v1425_v12 = vmul.f32 1.442695, %v1424_v17 }
0x199c   :  { %2609 = vpow2.f32 %v1425_v12 }
0x19a2   :  { %v2608_v59 = vpop.eup %2607 }
0x19a3   :  { %1433 = vrot.lane.b32.xlu0 %v2608_v59, %s2682_s23 }
0x19a6   :  { %v2610_v61 = vpop.eup %2609 }
0x19a7   :  { %v1427_v18 = vadd.f32 1.0, %v2610_v61 }
0x19a9   :  { %2611 = vrcp.f32 %v1427_v18 }
0x19b3   :  { %v2612_v19 = vpop.eup %2611 }
0x19b4   :  { %v1431_v22 = vmul.f32 %v2612_v19, %v1341_v2 }
0x1a15   :  { %v1434_v20 = vpop.permute.xlu0 %1433 }
0x1a16   :  { %v1436_v21 = vmul.f32 %v2612_v19, %v1434_v20 }
0x1a18   :  { %1438 = vrot.lane.b32.xlu1 %v1436_v21, %s2683_s3 }
0x1a8a   :  { %v1439_v42 = vpop.permute.xlu1 %1438 }
0x1a8b   :  { %v1441_v23 = vadd.f32 %v1439_v42, %v1431_v22 }
0x1a8d   :  { %2613 = vtanh.f32 %v1441_v23 }
0x1a97   :  { %v2614_v24 = vpop.eup %2613 }
0x1a98   :  { %1444 = vrot.lane.b32.xlu0 %v2614_v24, %s2682_s23 }
0x1b0a   :  { %v1445_v25 = vpop.permute.xlu0 %1444 }
0x1b0b   :  { %v1447_v26 = vmul.f32 %v2612_v19, %v1445_v25 }
0x1b0d   :  { %1449 = vrot.lane.b32.xlu1 %v1447_v26, %s2683_s3  ;;  %v1141_v26 = vadd.f32 %v2972_v11, %v3001_v7 }
0x1b7f   :  { %v1450_v27 = vpop.permute.xlu1 %1449 }
0x1b80   :  { %2354 = vmatmul.mubr.msk.f32.vlgmr.msra.gmra.mrb[14].mxu1 %vm183_vm2, %v1450_v27 }
0x1b81   :  { %2499 = vmatpush3.bf16.msra.mxu1 %v2936_v57  ;;  %2375 = vmatprep.mubr.msk.f32.mxu1 %vm2680_vm1, %v2681_v10 }
0x1b82   :  { %2500 = vmatprep.subr.bf16.mxu1 %v2679_v3 }
0x1b85   :  { %2502 = vmatpush3.bf16.msra.mxu1 %v2946_v63 }
0x1b86   :  { %2509 = vmatprep.subr.bf16.mxu1 %v2679_v3 }
0x1c53   :  { %v1519_v29 = vpop.f32.mrb[14].mxu1 }
0x1c54   :  { %v1523_v30 = vadd.f32 %v1519_v29, %v1126_v28  ;;  %v2355_v31 = vpop.f32.mrb[15].mxu1 }
0x1c56   :  { %2615 = vtanh.f32 %v1523_v30  ;;  %v1524_v33 = vsub.f32 0.0, %v1523_v30 }
0x1c58   :  { %v1525_v34 = vmul.f32 1.442695, %v1524_v33 }
0x1c5a   :  { %2617 = vpow2.f32 %v1525_v34 }
0x1c60   :  { %v2616_v32 = vpop.eup %2615 }
0x1c61   :  { %1533 = vrot.lane.b32.xlu0 %v2616_v32, %s2682_s23 }
0x1c64   :  { %v2618_v35 = vpop.eup %2617 }
0x1c65   :  { %v1527_v36 = vadd.f32 1.0, %v2618_v35 }
0x1c67   :  { %2619 = vrcp.f32 %v1527_v36 }
0x1c71   :  { %v2620_v37 = vpop.eup %2619 }
0x1c72   :  { %v1531_v45 = vmul.f32 %v2620_v37, %v1441_v23 }
0x1cd3   :  { %v1534_v39 = vpop.permute.xlu0 %1533 }
0x1cd4   :  { %v1536_v41 = vmul.f32 %v2620_v37, %v1534_v39 }
0x1cd6   :  { %1538 = vrot.lane.b32.xlu1 %v1536_v41, %s2683_s3 }
0x1d48   :  { %v1539_v40 = vpop.permute.xlu1 %1538 }
0x1d49   :  { %v1541_v62 = vadd.f32 %v1539_v40, %v1531_v45 }
0x1d4b   :  { %2621 = vtanh.f32 %v1541_v62 }
0x1d55   :  { %v2622_v46 = vpop.eup %2621 }
0x1d56   :  { %1544 = vrot.lane.b32.xlu0 %v2622_v46, %s2682_s23  ;;  %v1146_v46 = vadd.f32 %v2999_v5, %v2972_v11 }
0x1dc8   :  { %v1545_v47 = vpop.permute.xlu0 %1544 }
0x1dc9   :  { %v1547_v48 = vmul.f32 %v2620_v37, %v1545_v47 }
0x1dcb   :  { %1549 = vrot.lane.b32.xlu1 %v1547_v48, %s2683_s3 }
0x1e3d   :  { %v1550_v49 = vpop.permute.xlu1 %1549 }
0x1e3e   :  { %2365 = vmatmul.mubr.msk.f32.vlgmr.msra.gmra.mrb[24].mxu0 %vm183_vm2, %v1550_v49 }
0x1e3f   :  { %2505 = vmatpush3.bf16.msra.mxu0 %v2936_v57  ;;  %2386 = vmatprep.mubr.msk.f32.mxu0 %vm2680_vm1, %v2681_v10 }
0x1e40   :  { %2506 = vmatprep.subr.bf16.mxu0 %v2679_v3 }
0x1e43   :  { %2508 = vmatpush3.bf16.msra.mxu0 %v2946_v63 }
0x1e44   :  { %2515 = vmatprep.subr.bf16.mxu0 %v2679_v3 }
0x1f11   :  { %v1619_v51 = vpop.f32.mrb[24].mxu0 }
0x1f12   :  { %v1623_v52 = vadd.f32 %v1619_v51, %v1131_v50  ;;  %v2366_v53 = vpop.f32.mrb[25].mxu0 }
0x1f14   :  { %2623 = vtanh.f32 %v1623_v52  ;;  %v1624_v38 = vsub.f32 0.0, %v1623_v52 }
0x1f16   :  { %v1625_v55 = vmul.f32 1.442695, %v1624_v38 }
0x1f18   :  { %2625 = vpow2.f32 %v1625_v55 }
0x1f1e   :  { %v2624_v54 = vpop.eup %2623 }
0x1f1f   :  { %1633 = vrot.lane.b32.xlu0 %v2624_v54, %s2682_s23 }
0x1f22   :  { %v2626_v56 = vpop.eup %2625 }
0x1f23   :  { %v1627_v58 = vadd.f32 1.0, %v2626_v56 }
0x1f25   :  { %2627 = vrcp.f32 %v1627_v58 }
0x1f2f   :  { %v2628_v60 = vpop.eup %2627 }
0x1f30   :  { %v1631_v2 = vmul.f32 %v2628_v60, %v1541_v62 }
0x1f91   :  { %v1634_v0 = vpop.permute.xlu0 %1633 }
0x1f92   :  { %v1636_v1 = vmul.f32 %v2628_v60, %v1634_v0  ;;  %v1949_v0 = vld [vmem:[%s3108_s7 + $0x8] sm:$0xff] }
0x1f94   :  { %1638 = vrot.lane.b32.xlu1 %v1636_v1, %s2683_s3  ;;  %v1950_v1 = vld [vmem:[%s3108_s7 + $0x10] sm:$0xff] }
0x2006   :  { %v1639_v44 = vpop.permute.xlu1 %1638 }
0x2007   :  { %v1641_v6 = vadd.f32 %v1639_v44, %v1631_v2  ;;  %v1951_v44 = vld [vmem:[%s3108_s7 + $0x18] sm:$0xff] }
0x2009   :  { %2629 = vtanh.f32 %v1641_v6 }
0x2013   :  { %v2630_v4 = vpop.eup %2629 }
0x2014   :  { %1644 = vrot.lane.b32.xlu0 %v2630_v4, %s2682_s23 }
0x2086   :  { %v1645_v8 = vpop.permute.xlu0 %1644 }
0x2087   :  { %v1647_v13 = vmul.f32 %v2628_v60, %v1645_v8  ;;  %v1948_v60 = vld [vmem:[%s3108_s7] sm:$0xff]  ;;  %s2684_s7 = smov [#allocation3]  }
0x2088   :  { %v2516_v2 = vpack.c.bf16 %v1949_v0, %v1948_v60  ;;  %s2042_s16 = sshll.u32 %s2684_s7, 4  ;;  %s2043_s16 = int_to_ptr.vmem [resolvable:$true] %s2042_s16 }
0x2089   :  { %1649 = vrot.lane.b32.xlu1 %v1647_v13, %s2683_s3  ;;  %p2660_p1 = scmp.lt.s32.totalorder %s2043_s16, %s2043_s16 }
0x20fb   :  { %v1650_v14 = vpop.permute.xlu1 %1649 }
0x20fc   :  { %2376 = vmatmul.mubr.msk.f32.vlgmr.msra.gmra.mrb[16].mxu1 %vm183_vm2, %v1650_v14 }
0x20fd   :  { %2511 = vmatpush3.bf16.msra.mxu1 %v2936_v57  ;;  %2397 = vmatprep.mubr.msk.f32.mxu1 %vm2680_vm1, %v2681_v10 }
0x20fe   :  { %2512 = vmatprep.subr.bf16.mxu1 %v2679_v3 }
0x2101   :  { %2514 = vmatpush3.bf16.msra.mxu1 %v2946_v63 }
0x21cf   :  { %v1719_v15 = vpop.f32.mrb[16].mxu1 }
0x21d0   :  { %v1723_v16 = vadd.f32 %v1719_v15, %v1136_v9  ;;  %v2377_v59 = vpop.f32.mrb[17].mxu1  ;;  %v2082_v9 = vld [vmem:[%s3109_s8] ss:$0 sm:$0xff] }
0x21d2   :  { %2631 = vtanh.f32 %v1723_v16  ;;  %v1724_v12 = vsub.f32 0.0, %v1723_v16 }
0x21d4   :  { %v1725_v61 = vmul.f32 1.442695, %v1724_v12 }
0x21d6   :  { %2633 = vpow2.f32 %v1725_v61 }
0x21dc   :  { %v2632_v17 = vpop.eup %2631 }
0x21dd   :  { %1733 = vrot.lane.b32.xlu0 %v2632_v17, %s2682_s23 }
0x21e0   :  { %v2634_v57 = vpop.eup %2633 }
0x21e1   :  { %v1727_v18 = vadd.f32 1.0, %v2634_v57 }
0x21e3   :  { %2635 = vrcp.f32 %v1727_v18 }
0x21ed   :  { %v2636_v19 = vpop.eup %2635 }
0x21ee   :  { %v1731_v63 = vmul.f32 %v2636_v19, %v1641_v6  ;;  %v2519_v6 = vpack.c.bf16 %v1951_v44, %v1950_v1 }
0x224f   :  { %v1734_v20 = vpop.permute.xlu0 %1733 }
0x2250   :  { %v1736_v21 = vmul.f32 %v2636_v19, %v1734_v20 }
0x2252   :  { %1738 = vrot.lane.b32.xlu1 %v1736_v21, %s2683_s3 }
0x22c4   :  { %v1739_v43 = vpop.permute.xlu1 %1738 }
0x22c5   :  { %v1741_v22 = vadd.f32 %v1739_v43, %v1731_v63 }
0x22c7   :  { %2637 = vtanh.f32 %v1741_v22 }
0x22d1   :  { %v2638_v42 = vpop.eup %2637 }
0x22d2   :  { %1744 = vrot.lane.b32.xlu0 %v2638_v42, %s2682_s23 }
0x2344   :  { %v1745_v23 = vpop.permute.xlu0 %1744 }
0x2345   :  { %v1747_v24 = vmul.f32 %v2636_v19, %v1745_v23 }
0x2347   :  { %1749 = vrot.lane.b32.xlu1 %v1747_v24, %s2683_s3 }
0x23b9   :  { %v1750_v25 = vpop.permute.xlu1 %1749 }
0x23ba   :  { %2387 = vmatmul.mubr.msk.f32.vlgmr.msra.gmra.mrb[26].mxu0 %vm183_vm2, %v1750_v25 }
0x23bb   :  { %2408 = vmatprep.mubr.msk.f32.mxu0 %vm2680_vm1, %v2681_v10  ;;  %2517 = vmatpush3.bf16.msra.mxu0 %v2516_v2 }
0x23bc   :  { %2518 = vmatprep.subr.bf16.mxu0 %v2679_v3 }
0x23bf   :  { %2520 = vmatpush3.bf16.msra.mxu0 %v2519_v6 }
0x248d   :  { %v1819_v27 = vpop.f32.mrb[26].mxu0 }
0x248e   :  { %v1823_v28 = vadd.f32 %v1819_v27, %v1141_v26  ;;  %v2388_v29 = vpop.f32.mrb[27].mxu0 }
0x2490   :  { %2639 = vtanh.f32 %v1823_v28  ;;  %v1824_v31 = vsub.f32 0.0, %v1823_v28 }
0x2492   :  { %v1825_v32 = vmul.f32 1.442695, %v1824_v31 }
0x2494   :  { %2641 = vpow2.f32 %v1825_v32 }
0x249a   :  { %v2640_v30 = vpop.eup %2639 }
0x249b   :  { %1833 = vrot.lane.b32.xlu0 %v2640_v30, %s2682_s23 }
0x249e   :  { %v2642_v33 = vpop.eup %2641 }
0x249f   :  { %v1827_v34 = vadd.f32 1.0, %v2642_v33 }
0x24a1   :  { %2643 = vrcp.f32 %v1827_v34 }
0x24ab   :  { %v2644_v35 = vpop.eup %2643 }
0x24ac   :  { %v1831_v10 = vmul.f32 %v2644_v35, %v1741_v22 }
0x250d   :  { %v1834_v36 = vpop.permute.xlu0 %1833 }
0x250e   :  { %v1836_v37 = vmul.f32 %v2644_v35, %v1834_v36 }
0x2510   :  { %1838 = vrot.lane.b32.xlu1 %v1836_v37, %s2683_s3 }
0x2582   :  { %v1839_v7 = vpop.permute.xlu1 %1838 }
0x2583   :  { %v1841_v39 = vadd.f32 %v1839_v7, %v1831_v10 }
0x2585   :  { %2645 = vtanh.f32 %v1841_v39 }
0x258f   :  { %v2646_v41 = vpop.eup %2645 }
0x2590   :  { %1844 = vrot.lane.b32.xlu0 %v2646_v41, %s2682_s23 }
0x2602   :  { %v1845_v45 = vpop.permute.xlu0 %1844 }
0x2603   :  { %v1847_v40 = vmul.f32 %v2644_v35, %v1845_v45 }
0x2605   :  { %1849 = vrot.lane.b32.xlu1 %v1847_v40, %s2683_s3 }
0x2677   :  { %v1850_v62 = vpop.permute.xlu1 %1849 }
0x2678   :  { %2398 = vmatmul.mubr.msk.f32.vlgmr.msra.gmra.mrb[18].mxu1 %vm183_vm2, %v1850_v62 }
0x274b   :  { %v1919_v47 = vpop.f32.mrb[18].mxu1 }
0x274c   :  { %v1923_v48 = vadd.f32 %v1919_v47, %v1146_v46  ;;  %v2399_v49 = vpop.f32.mrb[19].mxu1 }
0x274e   :  { %2647 = vtanh.f32 %v1923_v48  ;;  %v1924_v51 = vsub.f32 0.0, %v1923_v48 }
0x2750   :  { %v1925_v52 = vmul.f32 1.442695, %v1924_v51 }
0x2752   :  { %2649 = vpow2.f32 %v1925_v52 }
0x2758   :  { %v2648_v50 = vpop.eup %2647 }
0x2759   :  { %1933 = vrot.lane.b32.xlu0 %v2648_v50, %s2682_s23 }
0x275c   :  { %v2650_v53 = vpop.eup %2649 }
0x275d   :  { %v1927_v54 = vadd.f32 1.0, %v2650_v53 }
0x275f   :  { %2651 = vrcp.f32 %v1927_v54 }
0x2769   :  { %v2652_v38 = vpop.eup %2651 }
0x276a   :  { %v1931_v58 = vmul.f32 %v2652_v38, %v1841_v39 }
0x27cb   :  { %v1934_v55 = vpop.permute.xlu0 %1933 }
0x27cc   :  { %v1936_v56 = vmul.f32 %v2652_v38, %v1934_v55 }
0x27ce   :  { %1938 = vrot.lane.b32.xlu1 %v1936_v56, %s2683_s3 }
0x2840   :  { %v1939_v11 = vpop.permute.xlu1 %1938 }
0x2841   :  { %v1941_v5 = vadd.f32 %v1939_v11, %v1931_v58 }
0x2843   :  { %2653 = vtanh.f32 %v1941_v5 }
0x284d   :  { %v2654_v4 = vpop.eup %2653 }
0x284e   :  { %1944 = vrot.lane.b32.xlu0 %v2654_v4, %s2682_s23  ;;  %s2655_s23 = scalar_lea.vmem %s2043_s16, 128 }
0x284f   :  { %p2656_p0 = scmp.ne.s32.totalorder %s2043_s16, %s2655_s23  ;;  %p2661_p2 = scmp.lt.s32.totalorder %s2655_s23, %s2655_s23 }
0x2851   :  { %p2662_p3 = por %p2661_p2, %p2660_p1 }
0x2853   :  { %p2663_p4 = pnand %p2662_p3, %p2656_p0 }
0x28c0   :  { %v1945_v8 = vpop.permute.xlu0 %1944 }
0x28c1   :  { %v1947_v13 = vmul.f32 %v2652_v38, %v1945_v8 }
0x28c3   :  { %1960 = vrot.lane.b32.xlu1 %v1947_v13, %s2683_s3 }
0x2935   :  { %v1961_v14 = vpop.permute.xlu1 %1960 }
0x2936   :  { %2409 = vmatmul.mubr.msk.f32.vlgmr.msra.gmra.mrb[28].mxu0 %vm183_vm2, %v1961_v14 }
0x2a09   :  { %v2030_v15 = vpop.f32.mrb[28].mxu0 }
0x2a0a   :  { %v2031_v3 = vadd.f32 %v2082_v9, %v2030_v15  ;;  %v2410_v16 = vpop.f32.mrb[29].mxu0 }
0x2a0c   :  { %2035 = vst.msk [vmem:[#allocation3] sm:$0xff] %vm2034_vm3, %v2031_v3 }
0x2a0d   :  { %2666 = shalt.err (!%p2663_p4)
}
0x2a0e   :  { %s2667_s18 = scalar_lea.hbm %s3110_s9, 128 }
0x2a0f   :  { %p2668_p5 = scmp.ne.s32.totalorder %s3110_s9, %s2667_s18  ;;  %p2671_p6 = scmp.lt.u32.totalorder %s2667_s18, %s3110_s9 }
0x2a11   :  { %p2673_p7 = pnand %p2671_p6, %p2668_p5 }
0x2a13   :  { %2676 = shalt.err (!%p2673_p7)
}
0x2a14   :  { %2045 = dma.vmem_to_hbm [thread:$0]  %s2043_s16, 128, %s3110_s9, [#allocation4]  }
0x2a15   :  { %2677 = dma.done.wait [#allocation4], 128  }
0x2a16   :  { %2678 = vsyncadd [#allocation4], 4294967168 }
0x2a17   :  { %2049 = vsyncpa [#allocation4], 1 }

</bundles_post_ra>
